<compile_context>
chip_gen: v6e
topology: v6e:2x2x1
jax: 0.10.0
libtpu: 0.0.40
codegen_flags: <defaults>
</compile_context>

<pallas_src>
import functools
import math

import jax
import jax.numpy as jnp
from jax.experimental import pallas as pl
from jax.experimental.pallas import tpu as pltpu

LN_EPS = 1e-12  # AST / classifier LayerNorm eps
# Scoped-VMEM budget: above v5e/v6e defaults, below v7x's 64 MiB physical.
_VMEM_LIMIT_BYTES = 48 * 1024 * 1024

_VMEM = pl.BlockSpec(memory_space=pltpu.MemorySpace.VMEM)


def _layernorm(v, g, b, eps=LN_EPS):
    mu = jnp.mean(v, axis=-1, keepdims=True)
    var = jnp.mean((v - mu) ** 2, axis=-1, keepdims=True)
    return (v - mu) * jax.lax.rsqrt(var + eps) * g + b


def _gelu(x):
    # TODO(synk): HF AST uses exact erf-GELU; tanh approximation kept here for
    # Mosaic portability (swap to an erf-based GELU if bit-closeness matters).
    c = math.sqrt(2.0 / math.pi)
    return 0.5 * x * (1.0 + jnp.tanh(c * (x + 0.044715 * x * x * x)))


def _row_tile(n, want, min_tile=8):
    """Largest tile <= want that divides n and is a multiple of min_tile; else n."""
    if want >= n:
        return n
    t = want
    while t >= min_tile:
        if n % t == 0 and t % min_tile == 0:
            return t
        t //= 2
    return n


# ----------------------------- Pallas kernels ------------------------------ #

def patch_embed_kernel(cols_ref, w_ref, b_ref, out_ref):
    """im2col'd patches [TP, P*P] @ W[P*P, H] + b  (the Conv2d patch embedding)."""
    out_ref[...] = (
        jnp.dot(cols_ref[...].astype(jnp.bfloat16), w_ref[...],
                preferred_element_type=jnp.float32)
        + b_ref[...]
    )


def qkv_kernel(x_ref, g_ref, b_ref, w_ref, bias_ref, out_ref):
    """layernorm_before + fused QKV projection on a token tile [TM, H]."""
    xn = _layernorm(x_ref[...], g_ref[...], b_ref[...])
    out_ref[...] = (
        jnp.dot(xn.astype(jnp.bfloat16), w_ref[...],
                preferred_element_type=jnp.float32)
        + bias_ref[...]
    ).astype(out_ref.dtype)


def attention_kernel(q_ref, k_ref, v_ref, o_ref, m_sc, l_sc, acc_sc, *, scale):
    """Flash-style online-softmax attention for one (batch, head) grid point.

    q_ref: [TQ, hd], k_ref/v_ref: [TK, hd]  (bf16).  Grid = (B*heads, QT, KT),
    KV axis innermost + 'arbitrary'; scratch accumulators carry across KV tiles.
    """
    ki = pl.program_id(2)

    @pl.when(ki == 0)
    def _():
        m_sc[...] = jnp.full(m_sc.shape, -jnp.inf, jnp.float32)
        l_sc[...] = jnp.zeros(l_sc.shape, jnp.float32)
        acc_sc[...] = jnp.zeros(acc_sc.shape, jnp.float32)

    # Fold the 1/sqrt(hd) scale into the (small) q tile; stays bf16 for the MXU.
    q = q_ref[...] * scale
    s = jnp.einsum('qd,kd->qk', q, k_ref[...],
                   preferred_element_type=jnp.float32)          # [TQ, TK] f32

    m_prev = m_sc[...]
    m_new = jnp.maximum(m_prev, jnp.max(s, axis=-1, keepdims=True))
    alpha = jnp.exp(m_prev - m_new)
    p = jnp.exp(s - m_new)
    l_sc[...] = alpha * l_sc[...] + jnp.sum(p, axis=-1, keepdims=True)
    acc_sc[...] = alpha * acc_sc[...] + jnp.dot(
        p.astype(jnp.bfloat16), v_ref[...], preferred_element_type=jnp.float32)
    m_sc[...] = m_new

    @pl.when(ki == pl.num_programs(2) - 1)
    def _():
        o_ref[...] = (acc_sc[...] *
                      pl.reciprocal(l_sc[...], approx=True)).astype(o_ref.dtype)


def post_attn_kernel(x_ref, ctx_ref, wo_ref, bo_ref, g2_ref, b2_ref,
                     wu_ref, bu_ref, wd_ref, bd_ref, out_ref):
    """Attention output projection + residual + layernorm_after + GELU MLP + residual."""
    x = x_ref[...]                                               # f32 residual stream
    attn = jnp.dot(ctx_ref[...], wo_ref[...],
                   preferred_element_type=jnp.float32) + bo_ref[...]
    x = x + attn
    hn = _layernorm(x, g2_ref[...], b2_ref[...])
    ff = jnp.dot(hn.astype(jnp.bfloat16), wu_ref[...],
                 preferred_element_type=jnp.float32) + bu_ref[...]
    ff = _gelu(ff)
    ff = jnp.dot(ff.astype(jnp.bfloat16), wd_ref[...],
                 preferred_element_type=jnp.float32) + bd_ref[...]
    out_ref[...] = x + ff


def head_kernel(cls_ref, dist_ref, flng, flnb, clng, clnb, w_ref, b_ref, out_ref):
    """ASTModel final LayerNorm + (cls+dist)/2 pooling + classifier LN/Linear."""
    c = _layernorm(cls_ref[...], flng[...], flnb[...])           # [B, H]
    d = _layernorm(dist_ref[...], flng[...], flnb[...])          # [B, H]
    pooled = 0.5 * (c + d)
    pooled = _layernorm(pooled, clng[...], clnb[...])            # classifier LayerNorm
    # Dropout(p=0.5) is identity at inference time.
    out_ref[...] = (
        jnp.dot(pooled.astype(jnp.bfloat16), w_ref[...],
                preferred_element_type=jnp.float32)
        + b_ref[...]
    )


# ------------------------------ encoder layer ------------------------------ #

def encoder_layer(h2d, lp, B, S, cfg):
    """One AST (ViT-style, pre-LN) encoder block.  h2d: [B*S, H] float32."""
    H = cfg['hidden']
    heads = cfg['heads']
    hd = H // heads
    I = cfg['inter']
    N = B * S
    TM = _row_tile(N, cfg.get('token_tile', 256), min_tile=16)

    (ln1g, ln1b, wqkv, bqkv, wo, bo,
     ln2g, ln2b, w_up, b_up, w_dn, b_dn) = lp

    # --- 1) pre-LN + fused QKV projection (token-tiled, bf16 MXU inputs) ---
    qkv = pl.pallas_call(
        qkv_kernel,
        out_shape=jax.ShapeDtypeStruct((N, 3 * H), jnp.bfloat16),
        grid=(N // TM,),
        in_specs=[
            pl.BlockSpec((TM, H), lambda i: (i, 0)),
            pl.BlockSpec((1, H), lambda i: (0, 0)),
            pl.BlockSpec((1, H), lambda i: (0, 0)),
            pl.BlockSpec((H, 3 * H), lambda i: (0, 0)),   # weight resident across tiles
            pl.BlockSpec((1, 3 * H), lambda i: (0, 0)),
        ],
        out_specs=pl.BlockSpec((TM, 3 * H), lambda i: (i, 0)),
        compiler_params=pltpu.CompilerParams(
            dimension_semantics=("parallel",),
            vmem_limit_bytes=_VMEM_LIMIT_BYTES),
        cost_estimate=pl.CostEstimate(
            flops=2 * N * H * 3 * H,
            transcendentals=0,
            bytes_accessed=4 * N * H + 2 * H * 3 * H + 2 * N * 3 * H),
    )(h2d, ln1g, ln1b, wqkv, bqkv)

    # --- 2) split heads (XLA glue) + flash-style attention kernel ---
    qkv5 = qkv.reshape(B, S, 3, heads, hd)
    q = qkv5[:, :, 0].transpose(0, 2, 1, 3).reshape(B * heads, S, hd)
    k = qkv5[:, :, 1].transpose(0, 2, 1, 3).reshape(B * heads, S, hd)
    v = qkv5[:, :, 2].transpose(0, 2, 1, 3).reshape(B * heads, S, hd)

    TQ = _row_tile(S, 128, min_tile=16)
    TK = _row_tile(S, 128, min_tile=16)
    scale = 1.0 / math.sqrt(hd)
    BH = B * heads

    ctx = pl.pallas_call(
        functools.partial(attention_kernel, scale=scale),
        out_shape=jax.ShapeDtypeStruct((BH, S, hd), jnp.bfloat16),
        grid=(BH, S // TQ, S // TK),
        in_specs=[
            pl.BlockSpec((None, TQ, hd), lambda bh, qi, ki: (bh, qi, 0)),
            pl.BlockSpec((None, TK, hd), lambda bh, qi, ki: (bh, ki, 0)),
            pl.BlockSpec((None, TK, hd), lambda bh, qi, ki: (bh, ki, 0)),
        ],
        out_specs=pl.BlockSpec((None, TQ, hd), lambda bh, qi, ki: (bh, qi, 0)),
        scratch_shapes=[
            pltpu.VMEM((TQ, 1), jnp.float32),    # running max
            pltpu.VMEM((TQ, 1), jnp.float32),    # running sum
            pltpu.VMEM((TQ, hd), jnp.float32),   # context accumulator
        ],
        compiler_params=pltpu.CompilerParams(
            dimension_semantics=("parallel", "parallel", "arbitrary"),
            vmem_limit_bytes=_VMEM_LIMIT_BYTES),
        cost_estimate=pl.CostEstimate(
            flops=4 * BH * S * S * hd,
            transcendentals=BH * S * S,
            bytes_accessed=3 * 2 * BH * S * hd + 2 * BH * S * hd),
    )(q, k, v)

    ctx2d = ctx.reshape(B, heads, S, hd).transpose(0, 2, 1, 3).reshape(N, H)

    # --- 3) attention output proj + residual + LN2 + GELU MLP + residual ---
    # TODO(synk): at real AST sizes on v7x (64 MiB VMEM), split the MLP up
    # projection over I in ~1024-column chunks instead of one resident block.
    return pl.pallas_call(
        post_attn_kernel,
        out_shape=jax.ShapeDtypeStruct((N, H), jnp.float32),
        grid=(N // TM,),
        in_specs=[
            pl.BlockSpec((TM, H), lambda i: (i, 0)),   # residual stream
            pl.BlockSpec((TM, H), lambda i: (i, 0)),   # attention context
            pl.BlockSpec((H, H), lambda i: (0, 0)),    # wo
            pl.BlockSpec((1, H), lambda i: (0, 0)),    # bo
            pl.BlockSpec((1, H), lambda i: (0, 0)),    # ln2 gamma
            pl.BlockSpec((1, H), lambda i: (0, 0)),    # ln2 beta
            pl.BlockSpec((H, I), lambda i: (0, 0)),    # mlp up
            pl.BlockSpec((1, I), lambda i: (0, 0)),
            pl.BlockSpec((I, H), lambda i: (0, 0)),    # mlp down
            pl.BlockSpec((1, H), lambda i: (0, 0)),
        ],
        out_specs=pl.BlockSpec((TM, H), lambda i: (i, 0)),
        compiler_params=pltpu.CompilerParams(
            dimension_semantics=("parallel",),
            vmem_limit_bytes=_VMEM_LIMIT_BYTES),
        cost_estimate=pl.CostEstimate(
            flops=2 * N * H * H + 4 * N * H * I,
            transcendentals=N * I,
            bytes_accessed=8 * N * H + 2 * N * H + 2 * (H * H + 2 * H * I)),
    )(h2d, ctx2d, wo, bo, ln2g, ln2b, w_up, b_up, w_dn, b_dn)


# ------------------------------ full forward ------------------------------- #

def ast_forward(x, params, cfg):
    B, T, F = x.shape
    P, fs, ts = cfg['patch'], cfg['fstride'], cfg['tstride']
    H, C = cfg['hidden'], cfg['n_classes']
    f_out = (F - P) // fs + 1
    t_out = (T - P) // ts + 1
    n_patches = f_out * t_out

    # --- patch embedding: Conv2d(1, H, P, stride=(fs, ts)) as im2col + matmul.
    #     im2col is a single XLA gather (no Python slice/stack loop).
    img = jnp.transpose(x, (0, 2, 1))                           # (B, F, T) == NCHW, C=1
    fidx = ((jnp.arange(f_out) * fs)[:, None, None, None]
            + jnp.arange(P)[None, None, :, None])               # (f_out, 1, P, 1)
    tidx = ((jnp.arange(t_out) * ts)[None, :, None, None]
            + jnp.arange(P)[None, None, None, :])               # (1, t_out, 1, P)
    cols = img[:, fidx, tidx]                                   # (B, f_out, t_out, P, P)
    cols = cols.reshape(B * n_patches, P * P)
    # TODO(synk): when loading real AST Conv2d weights, verify the (kH, kW)
    # flatten order of patch_w matches this (freq-major, time-minor) layout.

    n_rows = B * n_patches
    TP = _row_tile(n_rows, cfg.get('token_tile', 256), min_tile=8)
    pe = pl.pallas_call(
        patch_embed_kernel,
        out_shape=jax.ShapeDtypeStruct((n_rows, H), jnp.float32),
        grid=(n_rows // TP,),
        in_specs=[
            pl.BlockSpec((TP, P * P), lambda i: (i, 0)),
            pl.BlockSpec((P * P, H), lambda i: (0, 0)),
            pl.BlockSpec((1, H), lambda i: (0, 0)),
        ],
        out_specs=pl.BlockSpec((TP, H), lambda i: (i, 0)),
        compiler_params=pltpu.CompilerParams(
            dimension_semantics=("parallel",),
            vmem_limit_bytes=_VMEM_LIMIT_BYTES),
        cost_estimate=pl.CostEstimate(
            flops=2 * n_rows * P * P * H,
            transcendentals=0,
            bytes_accessed=4 * n_rows * P * P + 2 * P * P * H + 4 * n_rows * H),
    )(cols, params['patch_w'], params['patch_b'])
    patches = pe.reshape(B, n_patches, H)

    # --- cls + distillation tokens, position embeddings (XLA glue) ---
    cls = jnp.broadcast_to(params['cls_token'], (B, 1, H))
    dist = jnp.broadcast_to(params['dist_token'], (B, 1, H))
    hseq = jnp.concatenate([cls, dist, patches], axis=1) + params['pos_embed']
    S = n_patches + 2
    h2d = hseq.reshape(B * S, H).astype(jnp.float32)

    # --- transformer encoder layers ---
    # TODO(synk): overlap next-layer weight DMA with current-layer compute
    # (cross-call futures / emit_pipeline) for real-size AST, mainly on v5e.
    for lp in params['layers']:
        h2d = encoder_layer(h2d, lp, B, S, cfg)

    # --- final LN + (cls+dist)/2 pooling + classifier LN/Dropout/Linear ---
    h3 = h2d.reshape(B, S, H)
    cls_tok = h3[:, 0, :]
    dist_tok = h3[:, 1, :]
    logits_pad = pl.pallas_call(
        head_kernel,
        out_shape=jax.ShapeDtypeStruct((B, params['cls_w'].shape[1]), jnp.float32),
        in_specs=[_VMEM] * 8,
        out_specs=_VMEM,
    )(cls_tok, dist_tok,
      params['final_ln_g'], params['final_ln_b'],
      params['cls_ln_g'], params['cls_ln_b'],
      params['cls_w'], params['cls_b'])
    return logits_pad[:, :C]                 # lane-dense kernel output, slice after


# ----------------------------- parameter init ------------------------------ #

def init_params(key, cfg):
    H, P, I, C = cfg['hidden'], cfg['patch'], cfg['inter'], cfg['n_classes']
    n_tokens = cfg['n_patches'] + 2
    c_pad = ((C + 127) // 128) * 128          # lane-dense classifier output

    def nrm(k, shape, scale=0.02):
        return scale * jax.random.normal(k, shape, dtype=jnp.float32)

    keys = iter(jax.random.split(key, 16 + 8 * cfg['layers']))
    cls_w = jnp.zeros((H, c_pad), jnp.float32).at[:, :C].set(nrm(next(keys), (H, C)))
    params = {
        'patch_w': nrm(next(keys), (P * P, H)).astype(jnp.bfloat16),
        'patch_b': jnp.zeros((1, H), jnp.float32),
        'cls_token': nrm(next(keys), (1, 1, H)),
        'dist_token': nrm(next(keys), (1, 1, H)),
        'pos_embed': nrm(next(keys), (1, n_tokens, H)),
        'final_ln_g': jnp.ones((1, H), jnp.float32),
        'final_ln_b': jnp.zeros((1, H), jnp.float32),
        'cls_ln_g': jnp.ones((1, H), jnp.float32),
        'cls_ln_b': jnp.zeros((1, H), jnp.float32),
        'cls_w': cls_w.astype(jnp.bfloat16),
        'cls_b': jnp.zeros((1, c_pad), jnp.float32),
    }
    layers = []
    for _ in range(cfg['layers']):
        lp = (
            jnp.ones((1, H), jnp.float32), jnp.zeros((1, H), jnp.float32),   # ln_before
            nrm(next(keys), (H, 3 * H)).astype(jnp.bfloat16),                # fused Wqkv
            jnp.zeros((1, 3 * H), jnp.float32),
            nrm(next(keys), (H, H)).astype(jnp.bfloat16),                    # attn out
            jnp.zeros((1, H), jnp.float32),
            jnp.ones((1, H), jnp.float32), jnp.zeros((1, H), jnp.float32),   # ln_after
            nrm(next(keys), (H, I)).astype(jnp.bfloat16),                    # mlp up
            jnp.zeros((1, I), jnp.float32),
            nrm(next(keys), (I, H)).astype(jnp.bfloat16),                    # mlp down
            jnp.zeros((1, H), jnp.float32),
        )
        layers.append(lp)
    params['layers'] = layers
    return params


if __name__ == "__main__":
    # small synthetic AST config (real AST: hidden=768, 12 layers, 12 heads,
    # patch=16, strides=10, mel=128, time=1024, 527 classes)
    cfg = dict(patch=8, fstride=8, tstride=8, hidden=32, heads=4, inter=64,
               layers=2, n_classes=5, token_tile=16)
    B, T, F = 4, 56, 16
    f_out = (F - cfg['patch']) // cfg['fstride'] + 1
    t_out = (T - cfg['patch']) // cfg['tstride'] + 1
    cfg['n_patches'] = f_out * t_out          # 2 * 7 = 14  ->  S = 16 tokens

    key = jax.random.PRNGKey(0)
    kx, kp = jax.random.split(key)
    x = jax.random.normal(kx, (B, T, F), dtype=jnp.float32)
    params = init_params(kp, cfg)

    fwd = jax.jit(functools.partial(ast_forward, cfg=cfg))
    logits = fwd(x, params)
    logits = jax.block_until_ready(logits)
    assert logits.shape == (B, cfg['n_classes'])
    assert bool(jnp.all(jnp.isfinite(logits)))
    print("KERNEL_OK")
</pallas_src>

<mosaic_0001>
module attributes {stable_mosaic.version = 11 : i64} {
  func.func @patch_embed_kernel(%arg0: i32, %arg1: memref<8x64xf32, #tpu.memory_space<vmem>>, %arg2: memref<64x32xbf16, #tpu.memory_space<vmem>>, %arg3: memref<1x32xf32, #tpu.memory_space<vmem>>, %arg4: memref<8x32xf32, #tpu.memory_space<vmem>>) attributes {dimension_semantics = [#tpu.dimension_semantics<parallel>], iteration_bounds = array<i64: 7>, scalar_prefetch = 0 : i64, scratch_operands = 0 : i64, tpu.core_type = #tpu.core_type<tc>, window_params = [{transform_indices = @transform_0, window_bounds = array<i64: 8, 64>}, {pipeline_mode = #tpu.pipeline_mode<synchronous>, transform_indices = @transform_1, window_bounds = array<i64: 64, 32>}, {pipeline_mode = #tpu.pipeline_mode<synchronous>, transform_indices = @transform_2, window_bounds = array<i64: 1, 32>}, {transform_indices = @transform_3, window_bounds = array<i64: 8, 32>}]} {
    %c0 = arith.constant 0 : index
    %c0_0 = arith.constant 0 : index
    %0 = vector.load %arg1[%c0, %c0_0] : memref<8x64xf32, #tpu.memory_space<vmem>>, vector<8x64xf32>
    %1 = arith.truncf %0 : vector<8x64xf32> to vector<8x64xbf16>
    %c0_1 = arith.constant 0 : index
    %c0_2 = arith.constant 0 : index
    %2 = vector.load %arg2[%c0_1, %c0_2] : memref<64x32xbf16, #tpu.memory_space<vmem>>, vector<64x32xbf16>
    %cst = arith.constant dense<0.000000e+00> : vector<8x32xf32>
    %3 = tpu.matmul %1, %2, %cst {dimension_numbers = #tpu.dot_dimension_numbers<[1], [0], [0], [1], [0, 0, 1, 1], [], []>} : vector<8x64xbf16>, vector<64x32xbf16>, vector<8x32xf32> -> vector<8x32xf32>
    %c0_3 = arith.constant 0 : index
    %c0_4 = arith.constant 0 : index
    %4 = vector.load %arg3[%c0_3, %c0_4] : memref<1x32xf32, #tpu.memory_space<vmem>>, vector<1x32xf32>
    %5 = vector.broadcast %4 : vector<1x32xf32> to vector<8x32xf32>
    %6 = arith.addf %3, %5 : vector<8x32xf32>
    %c0_5 = arith.constant 0 : index
    %c0_6 = arith.constant 0 : index
    %7 = vector.load %arg4[%c0_5, %c0_6] : memref<8x32xf32, #tpu.memory_space<vmem>>, vector<8x32xf32>
    tpu.vector_store %arg4[%c0_5, %c0_6], %6 {strides = array<i32>} : memref<8x32xf32, #tpu.memory_space<vmem>>, vector<8x32xf32>,
    return
  }
  func.func @transform_0(%arg0: i32) -> (i32, i32) {
    %c0_i32 = arith.constant 0 : i32
    %c0_i32_0 = arith.constant 0 : i32
    return %arg0, %c0_i32 : i32, i32
  }
  func.func @transform_1(%arg0: i32) -> (i32, i32) {
    %c0_i32 = arith.constant 0 : i32
    %c0_i32_0 = arith.constant 0 : i32
    %c0_i32_1 = arith.constant 0 : i32
    return %c0_i32, %c0_i32_0 : i32, i32
  }
  func.func @transform_2(%arg0: i32) -> (i32, i32) {
    %c0_i32 = arith.constant 0 : i32
    %c0_i32_0 = arith.constant 0 : i32
    %c0_i32_1 = arith.constant 0 : i32
    return %c0_i32, %c0_i32_0 : i32, i32
  }
  func.func @transform_3(%arg0: i32) -> (i32, i32) {
    %c0_i32 = arith.constant 0 : i32
    %c0_i32_0 = arith.constant 0 : i32
    return %arg0, %c0_i32 : i32, i32
  }
}

module attributes {stable_mosaic.version = 11 : i64} {
  func.func @qkv_kernel(%arg0: i32, %arg1: memref<16x32xf32, #tpu.memory_space<vmem>>, %arg2: memref<1x32xf32, #tpu.memory_space<vmem>>, %arg3: memref<1x32xf32, #tpu.memory_space<vmem>>, %arg4: memref<32x96xbf16, #tpu.memory_space<vmem>>, %arg5: memref<1x96xf32, #tpu.memory_space<vmem>>, %arg6: memref<16x96xbf16, #tpu.memory_space<vmem>>) attributes {dimension_semantics = [#tpu.dimension_semantics<parallel>], iteration_bounds = array<i64: 4>, scalar_prefetch = 0 : i64, scratch_operands = 0 : i64, tpu.core_type = #tpu.core_type<tc>, window_params = [{transform_indices = @transform_0, window_bounds = array<i64: 16, 32>}, {pipeline_mode = #tpu.pipeline_mode<synchronous>, transform_indices = @transform_1, window_bounds = array<i64: 1, 32>}, {pipeline_mode = #tpu.pipeline_mode<synchronous>, transform_indices = @transform_2, window_bounds = array<i64: 1, 32>}, {pipeline_mode = #tpu.pipeline_mode<synchronous>, transform_indices = @transform_3, window_bounds = array<i64: 32, 96>}, {pipeline_mode = #tpu.pipeline_mode<synchronous>, transform_indices = @transform_4, window_bounds = array<i64: 1, 96>}, {transform_indices = @transform_5, window_bounds = array<i64: 16, 96>}]} {
    %c0 = arith.constant 0 : index
    %c0_0 = arith.constant 0 : index
    %0 = vector.load %arg1[%c0, %c0_0] : memref<16x32xf32, #tpu.memory_space<vmem>>, vector<16x32xf32>
    %c0_1 = arith.constant 0 : index
    %c0_2 = arith.constant 0 : index
    %1 = vector.load %arg2[%c0_1, %c0_2] : memref<1x32xf32, #tpu.memory_space<vmem>>, vector<1x32xf32>
    %c0_3 = arith.constant 0 : index
    %c0_4 = arith.constant 0 : index
    %2 = vector.load %arg3[%c0_3, %c0_4] : memref<1x32xf32, #tpu.memory_space<vmem>>, vector<1x32xf32>
    %cst = arith.constant dense<0.000000e+00> : vector<16xf32>
    %3 = vector.multi_reduction <add>, %0, %cst [1] : vector<16x32xf32> to vector<16xf32>
    %4 = vector.shape_cast %3 : vector<16xf32> to vector<16x1xf32>
    %cst_5 = arith.constant 3.200000e+01 : f32
    %5 = vector.broadcast %cst_5 : f32 to vector<16x1xf32>
    %6 = arith.divf %4, %5 : vector<16x1xf32>
    %7 = vector.broadcast %6 : vector<16x1xf32> to vector<16x32xf32>
    %8 = arith.subf %0, %7 : vector<16x32xf32>
    %9 = arith.mulf %8, %8 : vector<16x32xf32>
    %cst_6 = arith.constant dense<0.000000e+00> : vector<16xf32>
    %10 = vector.multi_reduction <add>, %9, %cst_6 [1] : vector<16x32xf32> to vector<16xf32>
    %11 = vector.shape_cast %10 : vector<16xf32> to vector<16x1xf32>
    %cst_7 = arith.constant 3.200000e+01 : f32
    %12 = vector.broadcast %cst_7 : f32 to vector<16x1xf32>
    %13 = arith.divf %11, %12 : vector<16x1xf32>
    %14 = vector.broadcast %6 : vector<16x1xf32> to vector<16x32xf32>
    %15 = arith.subf %0, %14 : vector<16x32xf32>
    %cst_8 = arith.constant 9.99999996E-13 : f32
    %16 = vector.broadcast %cst_8 : f32 to vector<16x1xf32>
    %17 = arith.addf %13, %16 : vector<16x1xf32>
    %18 = math.rsqrt %17 : vector<16x1xf32>
    %19 = vector.broadcast %18 : vector<16x1xf32> to vector<16x32xf32>
    %20 = arith.mulf %15, %19 : vector<16x32xf32>
    %21 = vector.broadcast %1 : vector<1x32xf32> to vector<16x32xf32>
    %22 = arith.mulf %20, %21 : vector<16x32xf32>
    %23 = vector.broadcast %2 : vector<1x32xf32> to vector<16x32xf32>
    %24 = arith.addf %22, %23 : vector<16x32xf32>
    %25 = arith.truncf %24 : vector<16x32xf32> to vector<16x32xbf16>
    %c0_9 = arith.constant 0 : index
    %c0_10 = arith.constant 0 : index
    %26 = vector.load %arg4[%c0_9, %c0_10] : memref<32x96xbf16, #tpu.memory_space<vmem>>, vector<32x96xbf16>
    %cst_11 = arith.constant dense<0.000000e+00> : vector<16x96xf32>
    %27 = tpu.matmul %25, %26, %cst_11 {dimension_numbers = #tpu.dot_dimension_numbers<[1], [0], [0], [1], [0, 0, 1, 1], [], []>} : vector<16x32xbf16>, vector<32x96xbf16>, vector<16x96xf32> -> vector<16x96xf32>
    %c0_12 = arith.constant 0 : index
    %c0_13 = arith.constant 0 : index
    %28 = vector.load %arg5[%c0_12, %c0_13] : memref<1x96xf32, #tpu.memory_space<vmem>>, vector<1x96xf32>
    %29 = vector.broadcast %28 : vector<1x96xf32> to vector<16x96xf32>
    %30 = arith.addf %27, %29 : vector<16x96xf32>
    %31 = arith.truncf %30 : vector<16x96xf32> to vector<16x96xbf16>
    %c0_14 = arith.constant 0 : index
    %c0_15 = arith.constant 0 : index
    %32 = vector.load %arg6[%c0_14, %c0_15] : memref<16x96xbf16, #tpu.memory_space<vmem>>, vector<16x96xbf16>
    tpu.vector_store %arg6[%c0_14, %c0_15], %31 {strides = array<i32>} : memref<16x96xbf16, #tpu.memory_space<vmem>>, vector<16x96xbf16>,
    return
  }
  func.func @transform_0(%arg0: i32) -> (i32, i32) {
    %c0_i32 = arith.constant 0 : i32
    %c0_i32_0 = arith.constant 0 : i32
    return %arg0, %c0_i32 : i32, i32
  }
  func.func @transform_1(%arg0: i32) -> (i32, i32) {
    %c0_i32 = arith.constant 0 : i32
    %c0_i32_0 = arith.constant 0 : i32
    %c0_i32_1 = arith.constant 0 : i32
    return %c0_i32, %c0_i32_0 : i32, i32
  }
  func.func @transform_2(%arg0: i32) -> (i32, i32) {
    %c0_i32 = arith.constant 0 : i32
    %c0_i32_0 = arith.constant 0 : i32
    %c0_i32_1 = arith.constant 0 : i32
    return %c0_i32, %c0_i32_0 : i32, i32
  }
  func.func @transform_3(%arg0: i32) -> (i32, i32) {
    %c0_i32 = arith.constant 0 : i32
    %c0_i32_0 = arith.constant 0 : i32
    %c0_i32_1 = arith.constant 0 : i32
    return %c0_i32, %c0_i32_0 : i32, i32
  }
  func.func @transform_4(%arg0: i32) -> (i32, i32) {
    %c0_i32 = arith.constant 0 : i32
    %c0_i32_0 = arith.constant 0 : i32
    %c0_i32_1 = arith.constant 0 : i32
    return %c0_i32, %c0_i32_0 : i32, i32
  }
  func.func @transform_5(%arg0: i32) -> (i32, i32) {
    %c0_i32 = arith.constant 0 : i32
    %c0_i32_0 = arith.constant 0 : i32
    return %arg0, %c0_i32 : i32, i32
  }
}

module attributes {stable_mosaic.version = 11 : i64} {
  func.func @attention_kernel(%arg0: i32, %arg1: i32, %arg2: i32, %arg3: memref<1x16x8xbf16, #tpu.memory_space<vmem>>, %arg4: memref<1x16x8xbf16, #tpu.memory_space<vmem>>, %arg5: memref<1x16x8xbf16, #tpu.memory_space<vmem>>, %arg6: memref<1x16x8xbf16, #tpu.memory_space<vmem>>, %arg7: memref<16x1xf32, #tpu.memory_space<vmem>>, %arg8: memref<16x1xf32, #tpu.memory_space<vmem>>, %arg9: memref<16x8xf32, #tpu.memory_space<vmem>>) attributes {dimension_semantics = [#tpu.dimension_semantics<parallel>, #tpu.dimension_semantics<parallel>, #tpu.dimension_semantics<arbitrary>], iteration_bounds = array<i64: 16, 1, 1>, scalar_prefetch = 0 : i64, scratch_operands = 3 : i64, tpu.core_type = #tpu.core_type<tc>, window_params = [{transform_indices = @transform_0, window_bounds = array<i64: 1, 16, 8>}, {transform_indices = @transform_1, window_bounds = array<i64: 1, 16, 8>}, {transform_indices = @transform_2, window_bounds = array<i64: 1, 16, 8>}, {transform_indices = @transform_3, window_bounds = array<i64: 1, 16, 8>}]} {
    %c0_i32 = arith.constant 0 : i32
    %0 = arith.cmpi eq, %arg2, %c0_i32 : i32
    %1 = arith.extui %0 : i1 to i32
    %c0_i32_0 = arith.constant 0 : i32
    %2 = arith.cmpi ne, %1, %c0_i32_0 : i32
    scf.if %2 {
      %cst_27 = arith.constant 0xFF800000 : f32
      %38 = vector.broadcast %cst_27 : f32 to vector<16x1xf32>
      %c0_28 = arith.constant 0 : index
      %c0_29 = arith.constant 0 : index
      %39 = vector.load %arg7[%c0_28, %c0_29] : memref<16x1xf32, #tpu.memory_space<vmem>>, vector<16x1xf32>
      tpu.vector_store %arg7[%c0_28, %c0_29], %38 {strides = array<i32>} : memref<16x1xf32, #tpu.memory_space<vmem>>, vector<16x1xf32>,
      %cst_30 = arith.constant 0.000000e+00 : f32
      %40 = vector.broadcast %cst_30 : f32 to vector<16x1xf32>
      %c0_31 = arith.constant 0 : index
      %c0_32 = arith.constant 0 : index
      %41 = vector.load %arg8[%c0_31, %c0_32] : memref<16x1xf32, #tpu.memory_space<vmem>>, vector<16x1xf32>
      tpu.vector_store %arg8[%c0_31, %c0_32], %40 {strides = array<i32>} : memref<16x1xf32, #tpu.memory_space<vmem>>, vector<16x1xf32>,
      %cst_33 = arith.constant 0.000000e+00 : f32
      %42 = vector.broadcast %cst_33 : f32 to vector<16x8xf32>
      %c0_34 = arith.constant 0 : index
      %c0_35 = arith.constant 0 : index
      %43 = vector.load %arg9[%c0_34, %c0_35] : memref<16x8xf32, #tpu.memory_space<vmem>>, vector<16x8xf32>
      tpu.vector_store %arg9[%c0_34, %c0_35], %42 {strides = array<i32>} : memref<16x8xf32, #tpu.memory_space<vmem>>, vector<16x8xf32>,
    } else {
    }
    %c0 = arith.constant 0 : index
    %c0_1 = arith.constant 0 : index
    %c0_2 = arith.constant 0 : index
    %3 = vector.load %arg3[%c0, %c0_1, %c0_2] : memref<1x16x8xbf16, #tpu.memory_space<vmem>>, vector<1x16x8xbf16>
    %4 = vector.shape_cast %3 : vector<1x16x8xbf16> to vector<16x8xbf16>
    %cst = arith.constant 3.535160e-01 : bf16
    %5 = vector.broadcast %cst : bf16 to vector<16x8xbf16>
    %6 = arith.mulf %4, %5 : vector<16x8xbf16>
    %c0_3 = arith.constant 0 : index
    %c0_4 = arith.constant 0 : index
    %c0_5 = arith.constant 0 : index
    %7 = vector.load %arg4[%c0_3, %c0_4, %c0_5] : memref<1x16x8xbf16, #tpu.memory_space<vmem>>, vector<1x16x8xbf16>
    %8 = vector.shape_cast %7 : vector<1x16x8xbf16> to vector<16x8xbf16>
    "tpu.trace_start"() <{level = 10 : i32, message = "qd,kd->qk"}> : () -> ()
    %cst_6 = arith.constant dense<0.000000e+00> : vector<16x16xf32>
    %9 = tpu.matmul %6, %8, %cst_6 {dimension_numbers = #tpu.dot_dimension_numbers<[1], [1], [0], [0], [0, 0, 1, 0], [], []>} : vector<16x8xbf16>, vector<16x8xbf16>, vector<16x16xf32> -> vector<16x16xf32>
    "tpu.trace_stop"() : () -> ()
    %c0_7 = arith.constant 0 : index
    %c0_8 = arith.constant 0 : index
    %10 = vector.load %arg7[%c0_7, %c0_8] : memref<16x1xf32, #tpu.memory_space<vmem>>, vector<16x1xf32>
    %cst_9 = arith.constant dense<0xFF800000> : vector<16xf32>
    %11 = vector.multi_reduction <maximumf>, %9, %cst_9 [1] : vector<16x16xf32> to vector<16xf32>
    %12 = vector.shape_cast %11 : vector<16xf32> to vector<16x1xf32>
    %13 = arith.maximumf %10, %12 : vector<16x1xf32>
    %14 = arith.subf %10, %13 : vector<16x1xf32>
    %15 = math.exp %14 : vector<16x1xf32>
    %16 = vector.broadcast %13 : vector<16x1xf32> to vector<16x16xf32>
    %17 = arith.subf %9, %16 : vector<16x16xf32>
    %18 = math.exp %17 : vector<16x16xf32>
    %c0_10 = arith.constant 0 : index
    %c0_11 = arith.constant 0 : index
    %19 = vector.load %arg8[%c0_10, %c0_11] : memref<16x1xf32, #tpu.memory_space<vmem>>, vector<16x1xf32>
    %20 = arith.mulf %15, %19 : vector<16x1xf32>
    %cst_12 = arith.constant dense<0.000000e+00> : vector<16xf32>
    %21 = vector.multi_reduction <add>, %18, %cst_12 [1] : vector<16x16xf32> to vector<16xf32>
    %22 = vector.shape_cast %21 : vector<16xf32> to vector<16x1xf32>
    %23 = arith.addf %20, %22 : vector<16x1xf32>
    %c0_13 = arith.constant 0 : index
    %c0_14 = arith.constant 0 : index
    %24 = vector.load %arg8[%c0_13, %c0_14] : memref<16x1xf32, #tpu.memory_space<vmem>>, vector<16x1xf32>
    tpu.vector_store %arg8[%c0_13, %c0_14], %23 {strides = array<i32>} : memref<16x1xf32, #tpu.memory_space<vmem>>, vector<16x1xf32>,
    %c0_15 = arith.constant 0 : index
    %c0_16 = arith.constant 0 : index
    %25 = vector.load %arg9[%c0_15, %c0_16] : memref<16x8xf32, #tpu.memory_space<vmem>>, vector<16x8xf32>
    %26 = vector.broadcast %15 : vector<16x1xf32> to vector<16x8xf32>
    %27 = arith.mulf %26, %25 : vector<16x8xf32>
    %28 = arith.truncf %18 : vector<16x16xf32> to vector<16x16xbf16>
    %c0_17 = arith.constant 0 : index
    %c0_18 = arith.constant 0 : index
    %c0_19 = arith.constant 0 : index
    %29 = vector.load %arg5[%c0_17, %c0_18, %c0_19] : memref<1x16x8xbf16, #tpu.memory_space<vmem>>, vector<1x16x8xbf16>
    %30 = vector.shape_cast %29 : vector<1x16x8xbf16> to vector<16x8xbf16>
    %cst_20 = arith.constant dense<0.000000e+00> : vector<16x8xf32>
    %31 = tpu.matmul %28, %30, %cst_20 {dimension_numbers = #tpu.dot_dimension_numbers<[1], [0], [0], [1], [0, 0, 1, 1], [], []>} : vector<16x16xbf16>, vector<16x8xbf16>, vector<16x8xf32> -> vector<16x8xf32>
    %32 = arith.addf %27, %31 : vector<16x8xf32>
    %c0_21 = arith.constant 0 : index
    %c0_22 = arith.constant 0 : index
    %33 = vector.load %arg9[%c0_21, %c0_22] : memref<16x8xf32, #tpu.memory_space<vmem>>, vector<16x8xf32>
    tpu.vector_store %arg9[%c0_21, %c0_22], %32 {strides = array<i32>} : memref<16x8xf32, #tpu.memory_space<vmem>>, vector<16x8xf32>,
    %c0_23 = arith.constant 0 : index
    %c0_24 = arith.constant 0 : index
    %34 = vector.load %arg7[%c0_23, %c0_24] : memref<16x1xf32, #tpu.memory_space<vmem>>, vector<16x1xf32>
    tpu.vector_store %arg7[%c0_23, %c0_24], %13 {strides = array<i32>} : memref<16x1xf32, #tpu.memory_space<vmem>>, vector<16x1xf32>,
    %c0_i32_25 = arith.constant 0 : i32
    %35 = arith.cmpi eq, %arg2, %c0_i32_25 : i32
    %36 = arith.extui %35 : i1 to i32
    %c0_i32_26 = arith.constant 0 : i32
    %37 = arith.cmpi ne, %36, %c0_i32_26 : i32
    scf.if %37 {
      %c0_27 = arith.constant 0 : index
      %c0_28 = arith.constant 0 : index
      %38 = vector.load %arg9[%c0_27, %c0_28] : memref<16x8xf32, #tpu.memory_space<vmem>>, vector<16x8xf32>
      %c0_29 = arith.constant 0 : index
      %c0_30 = arith.constant 0 : index
      %39 = vector.load %arg8[%c0_29, %c0_30] : memref<16x1xf32, #tpu.memory_space<vmem>>, vector<16x1xf32>
      %40 = tpu.reciprocal %39 {approx = true} : vector<16x1xf32> -> vector<16x1xf32>
      %41 = vector.broadcast %40 : vector<16x1xf32> to vector<16x8xf32>
      %42 = arith.mulf %38, %41 : vector<16x8xf32>
      %43 = arith.truncf %42 : vector<16x8xf32> to vector<16x8xbf16>
      %c0_31 = arith.constant 0 : index
      %c0_32 = arith.constant 0 : index
      %c0_33 = arith.constant 0 : index
      %44 = vector.load %arg6[%c0_31, %c0_32, %c0_33] : memref<1x16x8xbf16, #tpu.memory_space<vmem>>, vector<1x16x8xbf16>
      %45 = vector.shape_cast %44 : vector<1x16x8xbf16> to vector<16x8xbf16>
      %46 = vector.shape_cast %43 : vector<16x8xbf16> to vector<1x16x8xbf16>
      tpu.vector_store %arg6[%c0_31, %c0_32, %c0_33], %46 {strides = array<i32>} : memref<1x16x8xbf16, #tpu.memory_space<vmem>>, vector<1x16x8xbf16>,
    } else {
    }
    return
  }
  func.func @transform_0(%arg0: i32, %arg1: i32, %arg2: i32) -> (i32, i32, i32) {
    %c0_i32 = arith.constant 0 : i32
    %c0_i32_0 = arith.constant 0 : i32
    return %arg0, %arg1, %c0_i32 : i32, i32, i32
  }
  func.func @transform_1(%arg0: i32, %arg1: i32, %arg2: i32) -> (i32, i32, i32) {
    %c0_i32 = arith.constant 0 : i32
    %c0_i32_0 = arith.constant 0 : i32
    return %arg0, %arg2, %c0_i32 : i32, i32, i32
  }
  func.func @transform_2(%arg0: i32, %arg1: i32, %arg2: i32) -> (i32, i32, i32) {
    %c0_i32 = arith.constant 0 : i32
    %c0_i32_0 = arith.constant 0 : i32
    return %arg0, %arg2, %c0_i32 : i32, i32, i32
  }
  func.func @transform_3(%arg0: i32, %arg1: i32, %arg2: i32) -> (i32, i32, i32) {
    %c0_i32 = arith.constant 0 : i32
    %c0_i32_0 = arith.constant 0 : i32
    return %arg0, %arg1, %c0_i32 : i32, i32, i32
  }
}

module attributes {stable_mosaic.version = 11 : i64} {
  func.func @post_attn_kernel(%arg0: i32, %arg1: memref<16x32xf32, #tpu.memory_space<vmem>>, %arg2: memref<16x32xbf16, #tpu.memory_space<vmem>>, %arg3: memref<32x32xbf16, #tpu.memory_space<vmem>>, %arg4: memref<1x32xf32, #tpu.memory_space<vmem>>, %arg5: memref<1x32xf32, #tpu.memory_space<vmem>>, %arg6: memref<1x32xf32, #tpu.memory_space<vmem>>, %arg7: memref<32x64xbf16, #tpu.memory_space<vmem>>, %arg8: memref<1x64xf32, #tpu.memory_space<vmem>>, %arg9: memref<64x32xbf16, #tpu.memory_space<vmem>>, %arg10: memref<1x32xf32, #tpu.memory_space<vmem>>, %arg11: memref<16x32xf32, #tpu.memory_space<vmem>>) attributes {dimension_semantics = [#tpu.dimension_semantics<parallel>], iteration_bounds = array<i64: 4>, scalar_prefetch = 0 : i64, scratch_operands = 0 : i64, tpu.core_type = #tpu.core_type<tc>, window_params = [{transform_indices = @transform_0, window_bounds = array<i64: 16, 32>}, {transform_indices = @transform_1, window_bounds = array<i64: 16, 32>}, {pipeline_mode = #tpu.pipeline_mode<synchronous>, transform_indices = @transform_2, window_bounds = array<i64: 32, 32>}, {pipeline_mode = #tpu.pipeline_mode<synchronous>, transform_indices = @transform_3, window_bounds = array<i64: 1, 32>}, {pipeline_mode = #tpu.pipeline_mode<synchronous>, transform_indices = @transform_4, window_bounds = array<i64: 1, 32>}, {pipeline_mode = #tpu.pipeline_mode<synchronous>, transform_indices = @transform_5, window_bounds = array<i64: 1, 32>}, {pipeline_mode = #tpu.pipeline_mode<synchronous>, transform_indices = @transform_6, window_bounds = array<i64: 32, 64>}, {pipeline_mode = #tpu.pipeline_mode<synchronous>, transform_indices = @transform_7, window_bounds = array<i64: 1, 64>}, {pipeline_mode = #tpu.pipeline_mode<synchronous>, transform_indices = @transform_8, window_bounds = array<i64: 64, 32>}, {pipeline_mode = #tpu.pipeline_mode<synchronous>, transform_indices = @transform_9, window_bounds = array<i64: 1, 32>}, {transform_indices = @transform_10, window_bounds = array<i64: 16, 32>}]} {
    %c0 = arith.constant 0 : index
    %c0_0 = arith.constant 0 : index
    %0 = vector.load %arg1[%c0, %c0_0] : memref<16x32xf32, #tpu.memory_space<vmem>>, vector<16x32xf32>
    %c0_1 = arith.constant 0 : index
    %c0_2 = arith.constant 0 : index
    %1 = vector.load %arg2[%c0_1, %c0_2] : memref<16x32xbf16, #tpu.memory_space<vmem>>, vector<16x32xbf16>
    %c0_3 = arith.constant 0 : index
    %c0_4 = arith.constant 0 : index
    %2 = vector.load %arg3[%c0_3, %c0_4] : memref<32x32xbf16, #tpu.memory_space<vmem>>, vector<32x32xbf16>
    %cst = arith.constant dense<0.000000e+00> : vector<16x32xf32>
    %3 = tpu.matmul %1, %2, %cst {dimension_numbers = #tpu.dot_dimension_numbers<[1], [0], [0], [1], [0, 0, 1, 1], [], []>} : vector<16x32xbf16>, vector<32x32xbf16>, vector<16x32xf32> -> vector<16x32xf32>
    %c0_5 = arith.constant 0 : index
    %c0_6 = arith.constant 0 : index
    %4 = vector.load %arg4[%c0_5, %c0_6] : memref<1x32xf32, #tpu.memory_space<vmem>>, vector<1x32xf32>
    %5 = vector.broadcast %4 : vector<1x32xf32> to vector<16x32xf32>
    %6 = arith.addf %3, %5 : vector<16x32xf32>
    %7 = arith.addf %0, %6 : vector<16x32xf32>
    %c0_7 = arith.constant 0 : index
    %c0_8 = arith.constant 0 : index
    %8 = vector.load %arg5[%c0_7, %c0_8] : memref<1x32xf32, #tpu.memory_space<vmem>>, vector<1x32xf32>
    %c0_9 = arith.constant 0 : index
    %c0_10 = arith.constant 0 : index
    %9 = vector.load %arg6[%c0_9, %c0_10] : memref<1x32xf32, #tpu.memory_space<vmem>>, vector<1x32xf32>
    %cst_11 = arith.constant dense<0.000000e+00> : vector<16xf32>
    %10 = vector.multi_reduction <add>, %7, %cst_11 [1] : vector<16x32xf32> to vector<16xf32>
    %11 = vector.shape_cast %10 : vector<16xf32> to vector<16x1xf32>
    %cst_12 = arith.constant 3.200000e+01 : f32
    %12 = vector.broadcast %cst_12 : f32 to vector<16x1xf32>
    %13 = arith.divf %11, %12 : vector<16x1xf32>
    %14 = vector.broadcast %13 : vector<16x1xf32> to vector<16x32xf32>
    %15 = arith.subf %7, %14 : vector<16x32xf32>
    %16 = arith.mulf %15, %15 : vector<16x32xf32>
    %cst_13 = arith.constant dense<0.000000e+00> : vector<16xf32>
    %17 = vector.multi_reduction <add>, %16, %cst_13 [1] : vector<16x32xf32> to vector<16xf32>
    %18 = vector.shape_cast %17 : vector<16xf32> to vector<16x1xf32>
    %cst_14 = arith.constant 3.200000e+01 : f32
    %19 = vector.broadcast %cst_14 : f32 to vector<16x1xf32>
    %20 = arith.divf %18, %19 : vector<16x1xf32>
    %21 = vector.broadcast %13 : vector<16x1xf32> to vector<16x32xf32>
    %22 = arith.subf %7, %21 : vector<16x32xf32>
    %cst_15 = arith.constant 9.99999996E-13 : f32
    %23 = vector.broadcast %cst_15 : f32 to vector<16x1xf32>
    %24 = arith.addf %20, %23 : vector<16x1xf32>
    %25 = math.rsqrt %24 : vector<16x1xf32>
    %26 = vector.broadcast %25 : vector<16x1xf32> to vector<16x32xf32>
    %27 = arith.mulf %22, %26 : vector<16x32xf32>
    %28 = vector.broadcast %8 : vector<1x32xf32> to vector<16x32xf32>
    %29 = arith.mulf %27, %28 : vector<16x32xf32>
    %30 = vector.broadcast %9 : vector<1x32xf32> to vector<16x32xf32>
    %31 = arith.addf %29, %30 : vector<16x32xf32>
    %32 = arith.truncf %31 : vector<16x32xf32> to vector<16x32xbf16>
    %c0_16 = arith.constant 0 : index
    %c0_17 = arith.constant 0 : index
    %33 = vector.load %arg7[%c0_16, %c0_17] : memref<32x64xbf16, #tpu.memory_space<vmem>>, vector<32x64xbf16>
    %cst_18 = arith.constant dense<0.000000e+00> : vector<16x64xf32>
    %34 = tpu.matmul %32, %33, %cst_18 {dimension_numbers = #tpu.dot_dimension_numbers<[1], [0], [0], [1], [0, 0, 1, 1], [], []>} : vector<16x32xbf16>, vector<32x64xbf16>, vector<16x64xf32> -> vector<16x64xf32>
    %c0_19 = arith.constant 0 : index
    %c0_20 = arith.constant 0 : index
    %35 = vector.load %arg8[%c0_19, %c0_20] : memref<1x64xf32, #tpu.memory_space<vmem>>, vector<1x64xf32>
    %36 = vector.broadcast %35 : vector<1x64xf32> to vector<16x64xf32>
    %37 = arith.addf %34, %36 : vector<16x64xf32>
    %cst_21 = arith.constant 5.000000e-01 : f32
    %38 = vector.broadcast %cst_21 : f32 to vector<16x64xf32>
    %39 = arith.mulf %38, %37 : vector<16x64xf32>
    %cst_22 = arith.constant 4.471500e-02 : f32
    %40 = vector.broadcast %cst_22 : f32 to vector<16x64xf32>
    %41 = arith.mulf %40, %37 : vector<16x64xf32>
    %42 = arith.mulf %41, %37 : vector<16x64xf32>
    %43 = arith.mulf %42, %37 : vector<16x64xf32>
    %44 = arith.addf %37, %43 : vector<16x64xf32>
    %cst_23 = arith.constant 0.797884583 : f32
    %45 = vector.broadcast %cst_23 : f32 to vector<16x64xf32>
    %46 = arith.mulf %45, %44 : vector<16x64xf32>
    %47 = math.tanh %46 : vector<16x64xf32>
    %cst_24 = arith.constant 1.000000e+00 : f32
    %48 = vector.broadcast %cst_24 : f32 to vector<16x64xf32>
    %49 = arith.addf %48, %47 : vector<16x64xf32>
    %50 = arith.mulf %39, %49 : vector<16x64xf32>
    %51 = arith.truncf %50 : vector<16x64xf32> to vector<16x64xbf16>
    %c0_25 = arith.constant 0 : index
    %c0_26 = arith.constant 0 : index
    %52 = vector.load %arg9[%c0_25, %c0_26] : memref<64x32xbf16, #tpu.memory_space<vmem>>, vector<64x32xbf16>
    %cst_27 = arith.constant dense<0.000000e+00> : vector<16x32xf32>
    %53 = tpu.matmul %51, %52, %cst_27 {dimension_numbers = #tpu.dot_dimension_numbers<[1], [0], [0], [1], [0, 0, 1, 1], [], []>} : vector<16x64xbf16>, vector<64x32xbf16>, vector<16x32xf32> -> vector<16x32xf32>
    %c0_28 = arith.constant 0 : index
    %c0_29 = arith.constant 0 : index
    %54 = vector.load %arg10[%c0_28, %c0_29] : memref<1x32xf32, #tpu.memory_space<vmem>>, vector<1x32xf32>
    %55 = vector.broadcast %54 : vector<1x32xf32> to vector<16x32xf32>
    %56 = arith.addf %53, %55 : vector<16x32xf32>
    %57 = arith.addf %7, %56 : vector<16x32xf32>
    %c0_30 = arith.constant 0 : index
    %c0_31 = arith.constant 0 : index
    %58 = vector.load %arg11[%c0_30, %c0_31] : memref<16x32xf32, #tpu.memory_space<vmem>>, vector<16x32xf32>
    tpu.vector_store %arg11[%c0_30, %c0_31], %57 {strides = array<i32>} : memref<16x32xf32, #tpu.memory_space<vmem>>, vector<16x32xf32>,
    return
  }
  func.func @transform_0(%arg0: i32) -> (i32, i32) {
    %c0_i32 = arith.constant 0 : i32
    %c0_i32_0 = arith.constant 0 : i32
    return %arg0, %c0_i32 : i32, i32
  }
  func.func @transform_1(%arg0: i32) -> (i32, i32) {
    %c0_i32 = arith.constant 0 : i32
    %c0_i32_0 = arith.constant 0 : i32
    return %arg0, %c0_i32 : i32, i32
  }
  func.func @transform_2(%arg0: i32) -> (i32, i32) {
    %c0_i32 = arith.constant 0 : i32
    %c0_i32_0 = arith.constant 0 : i32
    %c0_i32_1 = arith.constant 0 : i32
    return %c0_i32, %c0_i32_0 : i32, i32
  }
  func.func @transform_3(%arg0: i32) -> (i32, i32) {
    %c0_i32 = arith.constant 0 : i32
    %c0_i32_0 = arith.constant 0 : i32
    %c0_i32_1 = arith.constant 0 : i32
    return %c0_i32, %c0_i32_0 : i32, i32
  }
  func.func @transform_4(%arg0: i32) -> (i32, i32) {
    %c0_i32 = arith.constant 0 : i32
    %c0_i32_0 = arith.constant 0 : i32
    %c0_i32_1 = arith.constant 0 : i32
    return %c0_i32, %c0_i32_0 : i32, i32
  }
  func.func @transform_5(%arg0: i32) -> (i32, i32) {
    %c0_i32 = arith.constant 0 : i32
    %c0_i32_0 = arith.constant 0 : i32
    %c0_i32_1 = arith.constant 0 : i32
    return %c0_i32, %c0_i32_0 : i32, i32
  }
  func.func @transform_6(%arg0: i32) -> (i32, i32) {
    %c0_i32 = arith.constant 0 : i32
    %c0_i32_0 = arith.constant 0 : i32
    %c0_i32_1 = arith.constant 0 : i32
    return %c0_i32, %c0_i32_0 : i32, i32
  }
  func.func @transform_7(%arg0: i32) -> (i32, i32) {
    %c0_i32 = arith.constant 0 : i32
    %c0_i32_0 = arith.constant 0 : i32
    %c0_i32_1 = arith.constant 0 : i32
    return %c0_i32, %c0_i32_0 : i32, i32
  }
  func.func @transform_8(%arg0: i32) -> (i32, i32) {
    %c0_i32 = arith.constant 0 : i32
    %c0_i32_0 = arith.constant 0 : i32
    %c0_i32_1 = arith.constant 0 : i32
    return %c0_i32, %c0_i32_0 : i32, i32
  }
  func.func @transform_9(%arg0: i32) -> (i32, i32) {
    %c0_i32 = arith.constant 0 : i32
    %c0_i32_0 = arith.constant 0 : i32
    %c0_i32_1 = arith.constant 0 : i32
    return %c0_i32, %c0_i32_0 : i32, i32
  }
  func.func @transform_10(%arg0: i32) -> (i32, i32) {
    %c0_i32 = arith.constant 0 : i32
    %c0_i32_0 = arith.constant 0 : i32
    return %arg0, %c0_i32 : i32, i32
  }
}

module attributes {stable_mosaic.version = 11 : i64} {
  func.func @head_kernel(%arg0: memref<4x32xf32, #tpu.memory_space<vmem>>, %arg1: memref<4x32xf32, #tpu.memory_space<vmem>>, %arg2: memref<1x32xf32, #tpu.memory_space<vmem>>, %arg3: memref<1x32xf32, #tpu.memory_space<vmem>>, %arg4: memref<1x32xf32, #tpu.memory_space<vmem>>, %arg5: memref<1x32xf32, #tpu.memory_space<vmem>>, %arg6: memref<32x128xbf16, #tpu.memory_space<vmem>>, %arg7: memref<1x128xf32, #tpu.memory_space<vmem>>, %arg8: memref<4x128xf32, #tpu.memory_space<vmem>>) attributes {dimension_semantics = [], scalar_prefetch = 0 : i64, scratch_operands = 0 : i64, tpu.core_type = #tpu.core_type<tc>} {
    %c0 = arith.constant 0 : index
    %c0_0 = arith.constant 0 : index
    %0 = vector.load %arg0[%c0, %c0_0] : memref<4x32xf32, #tpu.memory_space<vmem>>, vector<4x32xf32>
    %c0_1 = arith.constant 0 : index
    %c0_2 = arith.constant 0 : index
    %1 = vector.load %arg2[%c0_1, %c0_2] : memref<1x32xf32, #tpu.memory_space<vmem>>, vector<1x32xf32>
    %c0_3 = arith.constant 0 : index
    %c0_4 = arith.constant 0 : index
    %2 = vector.load %arg3[%c0_3, %c0_4] : memref<1x32xf32, #tpu.memory_space<vmem>>, vector<1x32xf32>
    %cst = arith.constant dense<0.000000e+00> : vector<4xf32>
    %3 = vector.multi_reduction <add>, %0, %cst [1] : vector<4x32xf32> to vector<4xf32>
    %4 = vector.shape_cast %3 : vector<4xf32> to vector<4x1xf32>
    %cst_5 = arith.constant 3.200000e+01 : f32
    %5 = vector.broadcast %cst_5 : f32 to vector<4x1xf32>
    %6 = arith.divf %4, %5 : vector<4x1xf32>
    %7 = vector.broadcast %6 : vector<4x1xf32> to vector<4x32xf32>
    %8 = arith.subf %0, %7 : vector<4x32xf32>
    %9 = arith.mulf %8, %8 : vector<4x32xf32>
    %cst_6 = arith.constant dense<0.000000e+00> : vector<4xf32>
    %10 = vector.multi_reduction <add>, %9, %cst_6 [1] : vector<4x32xf32> to vector<4xf32>
    %11 = vector.shape_cast %10 : vector<4xf32> to vector<4x1xf32>
    %cst_7 = arith.constant 3.200000e+01 : f32
    %12 = vector.broadcast %cst_7 : f32 to vector<4x1xf32>
    %13 = arith.divf %11, %12 : vector<4x1xf32>
    %14 = vector.broadcast %6 : vector<4x1xf32> to vector<4x32xf32>
    %15 = arith.subf %0, %14 : vector<4x32xf32>
    %cst_8 = arith.constant 9.99999996E-13 : f32
    %16 = vector.broadcast %cst_8 : f32 to vector<4x1xf32>
    %17 = arith.addf %13, %16 : vector<4x1xf32>
    %18 = math.rsqrt %17 : vector<4x1xf32>
    %19 = vector.broadcast %18 : vector<4x1xf32> to vector<4x32xf32>
    %20 = arith.mulf %15, %19 : vector<4x32xf32>
    %21 = vector.broadcast %1 : vector<1x32xf32> to vector<4x32xf32>
    %22 = arith.mulf %20, %21 : vector<4x32xf32>
    %23 = vector.broadcast %2 : vector<1x32xf32> to vector<4x32xf32>
    %24 = arith.addf %22, %23 : vector<4x32xf32>
    %c0_9 = arith.constant 0 : index
    %c0_10 = arith.constant 0 : index
    %25 = vector.load %arg1[%c0_9, %c0_10] : memref<4x32xf32, #tpu.memory_space<vmem>>, vector<4x32xf32>
    %c0_11 = arith.constant 0 : index
    %c0_12 = arith.constant 0 : index
    %26 = vector.load %arg2[%c0_11, %c0_12] : memref<1x32xf32, #tpu.memory_space<vmem>>, vector<1x32xf32>
    %c0_13 = arith.constant 0 : index
    %c0_14 = arith.constant 0 : index
    %27 = vector.load %arg3[%c0_13, %c0_14] : memref<1x32xf32, #tpu.memory_space<vmem>>, vector<1x32xf32>
    %cst_15 = arith.constant dense<0.000000e+00> : vector<4xf32>
    %28 = vector.multi_reduction <add>, %25, %cst_15 [1] : vector<4x32xf32> to vector<4xf32>
    %29 = vector.shape_cast %28 : vector<4xf32> to vector<4x1xf32>
    %cst_16 = arith.constant 3.200000e+01 : f32
    %30 = vector.broadcast %cst_16 : f32 to vector<4x1xf32>
    %31 = arith.divf %29, %30 : vector<4x1xf32>
    %32 = vector.broadcast %31 : vector<4x1xf32> to vector<4x32xf32>
    %33 = arith.subf %25, %32 : vector<4x32xf32>
    %34 = arith.mulf %33, %33 : vector<4x32xf32>
    %cst_17 = arith.constant dense<0.000000e+00> : vector<4xf32>
    %35 = vector.multi_reduction <add>, %34, %cst_17 [1] : vector<4x32xf32> to vector<4xf32>
    %36 = vector.shape_cast %35 : vector<4xf32> to vector<4x1xf32>
    %cst_18 = arith.constant 3.200000e+01 : f32
    %37 = vector.broadcast %cst_18 : f32 to vector<4x1xf32>
    %38 = arith.divf %36, %37 : vector<4x1xf32>
    %39 = vector.broadcast %31 : vector<4x1xf32> to vector<4x32xf32>
    %40 = arith.subf %25, %39 : vector<4x32xf32>
    %cst_19 = arith.constant 9.99999996E-13 : f32
    %41 = vector.broadcast %cst_19 : f32 to vector<4x1xf32>
    %42 = arith.addf %38, %41 : vector<4x1xf32>
    %43 = math.rsqrt %42 : vector<4x1xf32>
    %44 = vector.broadcast %43 : vector<4x1xf32> to vector<4x32xf32>
    %45 = arith.mulf %40, %44 : vector<4x32xf32>
    %46 = vector.broadcast %26 : vector<1x32xf32> to vector<4x32xf32>
    %47 = arith.mulf %45, %46 : vector<4x32xf32>
    %48 = vector.broadcast %27 : vector<1x32xf32> to vector<4x32xf32>
    %49 = arith.addf %47, %48 : vector<4x32xf32>
    %50 = arith.addf %24, %49 : vector<4x32xf32>
    %cst_20 = arith.constant 5.000000e-01 : f32
    %51 = vector.broadcast %cst_20 : f32 to vector<4x32xf32>
    %52 = arith.mulf %51, %50 : vector<4x32xf32>
    %c0_21 = arith.constant 0 : index
    %c0_22 = arith.constant 0 : index
    %53 = vector.load %arg4[%c0_21, %c0_22] : memref<1x32xf32, #tpu.memory_space<vmem>>, vector<1x32xf32>
    %c0_23 = arith.constant 0 : index
    %c0_24 = arith.constant 0 : index
    %54 = vector.load %arg5[%c0_23, %c0_24] : memref<1x32xf32, #tpu.memory_space<vmem>>, vector<1x32xf32>
    %cst_25 = arith.constant dense<0.000000e+00> : vector<4xf32>
    %55 = vector.multi_reduction <add>, %52, %cst_25 [1] : vector<4x32xf32> to vector<4xf32>
    %56 = vector.shape_cast %55 : vector<4xf32> to vector<4x1xf32>
    %cst_26 = arith.constant 3.200000e+01 : f32
    %57 = vector.broadcast %cst_26 : f32 to vector<4x1xf32>
    %58 = arith.divf %56, %57 : vector<4x1xf32>
    %59 = vector.broadcast %58 : vector<4x1xf32> to vector<4x32xf32>
    %60 = arith.subf %52, %59 : vector<4x32xf32>
    %61 = arith.mulf %60, %60 : vector<4x32xf32>
    %cst_27 = arith.constant dense<0.000000e+00> : vector<4xf32>
    %62 = vector.multi_reduction <add>, %61, %cst_27 [1] : vector<4x32xf32> to vector<4xf32>
    %63 = vector.shape_cast %62 : vector<4xf32> to vector<4x1xf32>
    %cst_28 = arith.constant 3.200000e+01 : f32
    %64 = vector.broadcast %cst_28 : f32 to vector<4x1xf32>
    %65 = arith.divf %63, %64 : vector<4x1xf32>
    %66 = vector.broadcast %58 : vector<4x1xf32> to vector<4x32xf32>
    %67 = arith.subf %52, %66 : vector<4x32xf32>
    %cst_29 = arith.constant 9.99999996E-13 : f32
    %68 = vector.broadcast %cst_29 : f32 to vector<4x1xf32>
    %69 = arith.addf %65, %68 : vector<4x1xf32>
    %70 = math.rsqrt %69 : vector<4x1xf32>
    %71 = vector.broadcast %70 : vector<4x1xf32> to vector<4x32xf32>
    %72 = arith.mulf %67, %71 : vector<4x32xf32>
    %73 = vector.broadcast %53 : vector<1x32xf32> to vector<4x32xf32>
    %74 = arith.mulf %72, %73 : vector<4x32xf32>
    %75 = vector.broadcast %54 : vector<1x32xf32> to vector<4x32xf32>
    %76 = arith.addf %74, %75 : vector<4x32xf32>
    %77 = arith.truncf %76 : vector<4x32xf32> to vector<4x32xbf16>
    %c0_30 = arith.constant 0 : index
    %c0_31 = arith.constant 0 : index
    %78 = vector.load %arg6[%c0_30, %c0_31] : memref<32x128xbf16, #tpu.memory_space<vmem>>, vector<32x128xbf16>
    %cst_32 = arith.constant dense<0.000000e+00> : vector<4x128xf32>
    %79 = tpu.matmul %77, %78, %cst_32 {dimension_numbers = #tpu.dot_dimension_numbers<[1], [0], [0], [1], [0, 0, 1, 1], [], []>} : vector<4x32xbf16>, vector<32x128xbf16>, vector<4x128xf32> -> vector<4x128xf32>
    %c0_33 = arith.constant 0 : index
    %c0_34 = arith.constant 0 : index
    %80 = vector.load %arg7[%c0_33, %c0_34] : memref<1x128xf32, #tpu.memory_space<vmem>>, vector<1x128xf32>
    %81 = vector.broadcast %80 : vector<1x128xf32> to vector<4x128xf32>
    %82 = arith.addf %79, %81 : vector<4x128xf32>
    %c0_35 = arith.constant 0 : index
    %c0_36 = arith.constant 0 : index
    %83 = vector.load %arg8[%c0_35, %c0_36] : memref<4x128xf32, #tpu.memory_space<vmem>>, vector<4x128xf32>
    tpu.vector_store %arg8[%c0_35, %c0_36], %82 {strides = array<i32>} : memref<4x128xf32, #tpu.memory_space<vmem>>, vector<4x128xf32>,
    return
  }
}

</mosaic_0001>

<bundles_post_ra>
// kernel: ast_forward.8
= control target key start
LH: loop header
LB: loop body
LE: loop exit
PB: predicated region body
PF: predicated region fallthrough
CT: control target
= control target key end

     0   :  { %s383_s12 = smov 0   ;;  %s415_s0 = inlined_call_operand.vmem [shape: f32[56,64], index: 0, kind: input, shape index: {}]   ;;  %s416_s1 = inlined_call_operand.vmem [shape: bf16[64,32], index: 1, kind: input, shape index: {}]   ;;  %s417_s2 = inlined_call_operand.vmem [shape: f32[1,32], index: 2, kind: input, shape index: {}]   ;;  %s418_s3 = inlined_call_operand.vmem [shape: f32[56,32], index: 3, kind: output, shape index: {}]  }
   0x1 LB: > { %s307_s13 = sadd.s32 4294967295, %s359_s12   ;;  %p311_p0 = scmp.ge.s32.totalorder %s359_s12, 1  ;;  %s359_s12 = sphi %s383_s12, %s13_s12  }
   0x2   : > { %p136_p1 = scmp.lt.s32.totalorder %s359_s12, 8 }
   0x4   : > { %p137_p2 = pnand %p311_p0, %p136_p1 }
   0x5   : > { %p158_p3 = scmp.lt.s32.totalorder (!%p137_p2), %s307_s13, 6 }
   0x6   : > { %140 = sbr.rel (%p137_p2) target bundleno = 227 (0xe3), region = 32 }
   0xb   : > { %v349_v0 = vld [vmem:[%s416_s1 + $0x18] sm:$0xff]   ;;  %v361_v1 = vmov 0.0   ;;  %v350_v2 = vld [vmem:[%s416_s1 + $0x10] sm:$0xff]   ;;  %vm362_vm0 = vmmov 0   ;;  %s420_s13 = smov (!%p158_p3, %s307_s13), 6  ;;  %v351_v3 = vld [vmem:[%s416_s1 + $0x8] sm:$0xff]  }
   0xc   : > { %327 = vmatprep.subr.bf16.mxu0 %v361_v1  ;;  %335 = vmatprep.mubr.msk.bf16.mxu0 %vm362_vm0, %v361_v1  ;;  %s312_s20 = sshll.u32 %s420_s13, 3  ;;  %v352_v4 = vld [vmem:[%s416_s1] sm:$0xff]   ;;  %vm208_vm1 = vcmask 523264   ;;  %vm252_vm2 = vcmask 261120  }
   0xd   : > { %328 = vmatpush3.bf16.msra.mxu0 %v349_v0  ;;  %s161_s23 = scalar_lea.vmem %s415_s0, %s312_s20  ;;  %v314_v7 = vld [vmem:[%s417_s2] ss:$0 sm:$0xff]  ;;  %s165_s30 = scalar_lea.vmem %s418_s3, %s312_s20 }
   0xe   : > { %329 = vmatprep.subr.bf16.mxu0 %v361_v1  ;;  %v167_v5 = vld [vmem:[%s161_s23] sm:$0xff] }
   0xf   : > { %v168_v6 = vpack.c.bf16 %v167_v5, %v167_v5 }
  0x11   : > { %330 = vmatpush3.bf16.msra.mxu0 %v350_v2 }
  0x12   : > { %331 = vmatprep.subr.bf16.mxu0 %v361_v1 }
  0x15   : > { %332 = vmatpush3.bf16.msra.mxu0 %v351_v3 }
  0x16   : > { %333 = vmatprep.subr.bf16.mxu0 %v361_v1 }
  0x19   : > { %334 = vmatpush3.bf16.msra.mxu0 %v352_v4 }
  0x1c   : > { %336 = vmatmul.mubr.msk.bf16.vlgmr.msra.gmra.mxu0 %vm208_vm1, %v168_v6 }
  0xdc   : > { %v246_v8 = vpop.f32.mrf.mxu0 }
  0xdd   : > { %v247_v9 = vadd.f32 %v314_v7, %v246_v8 }
  0xde   : > { %v337_v10 = vpop.f32.mrf.mxu0 }
  0xdf   : > { %253 = vst.msk [vmem:[%s165_s30] sm:$0xff] %vm252_vm2, %v247_v9 }
  0xe0   : > { %v249_v11 = vpop.f32.mrf.mxu0 }
  0xe2   : > { %v338_v12 = vpop.f32.mrf.mxu0 }
  0xe3 PF: > { %s13_s12 = sadd.s32 1, %s359_s12  }
  0xe4   : > { %p10_p4 = scmp.ge.s32.totalorder %s13_s12, 9  }
  0xe6   :  { %12 = sbr.rel (!%p10_p4) target bundleno = 1 (0x1), region = 62 }

// kernel: ast_forward.9
= control target key start
LH: loop header
LB: loop body
LE: loop exit
PB: predicated region body
PF: predicated region fallthrough
CT: control target
= control target key end

     0   :  { %s500_s18 = smov 0   ;;  %s541_s0 = inlined_call_operand.vmem [shape: f32[64,32], index: 0, kind: input, shape index: {}]   ;;  %s542_s1 = inlined_call_operand.vmem [shape: f32[1,32], index: 1, kind: input, shape index: {}]   ;;  %s543_s2 = inlined_call_operand.vmem [shape: f32[1,32], index: 2, kind: input, shape index: {}]   ;;  %s544_s3 = inlined_call_operand.vmem [shape: bf16[32,96], index: 3, kind: input, shape index: {}]   ;;  %s545_s4 = inlined_call_operand.vmem [shape: f32[1,96], index: 4, kind: input, shape index: {}]   ;;  %s546_s5 = inlined_call_operand.vmem [shape: bf16[64,96], index: 5, kind: output, shape index: {}]  }
   0x1 LB: > { %s412_s19 = sadd.s32 4294967295, %s466_s18   ;;  %p416_p0 = scmp.ge.s32.totalorder %s466_s18, 1  ;;  %s466_s18 = sphi %s500_s18, %s15_s18  }
   0x2   : > { %p188_p1 = scmp.lt.s32.totalorder %s466_s18, 5 }
   0x4   : > { %p189_p2 = pnand %p416_p0, %p188_p1 }
   0x5   : > { %s417_s20 = sshll.u32 (!%p189_p2), %s412_s19, 1 }
   0x6   : > { %192 = sbr.rel (%p189_p2) target bundleno = 531 (0x213), region = 40  ;;  %p217_p3 = scmp.lt.s32.totalorder (!%p189_p2), %s417_s20, 7 }
   0xb   : > { %s548_s20 = smov (!%p217_p3, %s417_s20), 7  ;;  %vm233_vm0 = vcmask 261120   ;;  %v454_v14 = vld [vmem:[%s544_s3 + $0x8] sm:$0xff]   ;;  %v468_v15 = vmov 0.0   ;;  %vm469_vm1 = vmmov 0   ;;  %v455_v16 = vld [vmem:[%s544_s3] sm:$0xff]  }
   0xc   : > { %s418_s21 = sshll.u32 %s548_s20, 3  ;;  %436 = vmatprep.subr.bf16.mxu0 %v468_v15  ;;  %440 = vmatprep.mubr.msk.bf16.mxu0 %vm469_vm1, %v468_v15  ;;  %v421_v25 = vld [vmem:[%s542_s1] ss:$0 sm:$0xff]  ;;  %s420_s10 = sshll.u32 %s548_s20, 2  ;;  %vm353_vm2 = vcmask 781312  }
   0xd   : > { %s220_s24 = scalar_lea.vmem %s541_s0, %s418_s21  ;;  %437 = vmatpush3.bf16.msra.mxu0 %v454_v14  ;;  %v422_v29 = vld [vmem:[%s543_s2] ss:$0 sm:$0xff]  ;;  %s226_s13 = scalar_lea.vmem %s546_s5, %s420_s10 }
   0xe   : > { %v229_v0 = vld [vmem:[%s220_s24] sm:$0xff]  ;;  %v230_v1 = vld [vmem:[%s220_s24 + $0x8] sm:$0xff]  ;;  %438 = vmatprep.subr.bf16.mxu0 %v468_v15 }
   0xf   : > { %v234_v2 = vsel %vm233_vm0, %v229_v0, 0.0  ;;  %v237_v3 = vsel %vm233_vm0, %v230_v1, 0.0  ;;  %v423_v34 = vld [vmem:[%s545_s4] ss:$0 sm:$0xff] }
  0x10   : > { %235 = vadd.xlane.f32.xlu0 %v234_v2 }
  0x11   : > { %439 = vmatpush3.bf16.msra.mxu0 %v455_v16 }
  0x14   : > { %238 = vadd.xlane.f32.xlu0 %v237_v3 }
  0x99   : > { %v236_v4 = vpop.xlane.xlu0 %235 }
  0x9a   : > { %v241_v5 = vmul.f32 0.03125, %v236_v4 }
  0x9c   : > { %v243_v6 = vsub.f32 %v229_v0, %v241_v5 }
  0x9d   : > { %v239_v7 = vpop.xlane.xlu0 %238 }
  0x9e   : > { %v242_v8 = vmul.f32 0.03125, %v239_v7  ;;  %v245_v9 = vmul.f32 %v243_v6, %v243_v6 }
  0xa0   : > { %v244_v10 = vsub.f32 %v230_v1, %v242_v8  ;;  %v247_v11 = vsel %vm233_vm0, %v245_v9, 0.0 }
  0xa1   : > { %248 = vadd.xlane.f32.xlu1 %v247_v11 }
  0xa2   : > { %v246_v12 = vmul.f32 %v244_v10, %v244_v10 }
  0xa4   : > { %v250_v13 = vsel %vm233_vm0, %v246_v12, 0.0 }
  0xa5   : > { %251 = vadd.xlane.f32.xlu1 %v250_v13 }
 0x12a   : > { %v249_v17 = vpop.xlane.xlu1 %248 }
 0x12b   : > { %v253_v18 = vmul.f32 0.03125, %v249_v17 }
 0x12d   : > { %v255_v19 = vadd.f32 1e-12, %v253_v18 }
 0x12e   : > { %v252_v20 = vpop.xlane.xlu1 %251 }
 0x12f   : > { %456 = vrsqrt.f32 %v255_v19  ;;  %v254_v21 = vmul.f32 0.03125, %v252_v20 }
 0x131   : > { %v256_v22 = vadd.f32 1e-12, %v254_v21 }
 0x133   : > { %458 = vrsqrt.f32 %v256_v22 }
 0x13c   : > { %v457_v23 = vpop.eup %456 }
 0x13d   : > { %v259_v24 = vmul.f32 %v457_v23, %v243_v6 }
 0x13f   : > { %v267_v28 = vmul.f32 %v421_v25, %v259_v24 }
 0x140   : > { %v459_v26 = vpop.eup %458 }
 0x141   : > { %v260_v27 = vmul.f32 %v459_v26, %v244_v10  ;;  %v275_v31 = vadd.f32 %v422_v29, %v267_v28 }
 0x143   : > { %v268_v30 = vmul.f32 %v421_v25, %v260_v27 }
 0x145   : > { %v276_v32 = vadd.f32 %v422_v29, %v268_v30 }
 0x147   : > { %v277_v33 = vpack.c.bf16 %v276_v32, %v275_v31 }
 0x149   : > { %441 = vmatmul.mubr.msk.bf16.vlgmr.msra.gmra.mxu0 %vm233_vm0, %v277_v33 }
 0x209   : > { %v338_v35 = vpop.f32.mrf.mxu0 }
 0x20a   : > { %v339_v36 = vadd.f32 %v423_v34, %v338_v35 }
 0x20b   : > { %v442_v37 = vpop.f32.mrf.mxu0 }
 0x20c   : > { %v431_v38 = vpack.c.bf16 %v339_v36, %v339_v36 }
 0x20d   : > { %v341_v39 = vpop.f32.mrf.mxu0 }
 0x20e   : > { %354 = vst.msk [vmem:[%s226_s13] sm:$0xf] %vm353_vm2, %v431_v38  ;;  %v342_v40 = vadd.f32 %v423_v34, %v341_v39 }
 0x20f   : > { %v443_v41 = vpop.f32.mrf.mxu0 }
 0x210   : > { %v432_v42 = vpack.c.bf16 %v342_v40, %v342_v40 }
 0x212   : > { %355 = vst.msk [vmem:[%s226_s13 + $0x4] sm:$0xf] %vm353_vm2, %v432_v42 }
 0x213 PF: > { %s15_s18 = sadd.s32 1, %s466_s18  }
 0x214   : > { %p12_p4 = scmp.ge.s32.totalorder %s15_s18, 6  }
 0x216   :  { %14 = sbr.rel (!%p12_p4) target bundleno = 1 (0x1), region = 70 }

// kernel: ast_forward.10
= control target key start
LH: loop header
LB: loop body
LE: loop exit
PB: predicated region body
PF: predicated region fallthrough
CT: control target
= control target key end

     0   :  { %s782_s12 = smov 0   ;;  %s784_s13 = smov 0   ;;  %s846_s0 = inlined_call_operand.vmem [shape: bf16[16,16,8], index: 0, kind: input, shape index: {}]   ;;  %s847_s1 = inlined_call_operand.vmem [shape: bf16[16,16,8], index: 1, kind: input, shape index: {}]   ;;  %s848_s2 = inlined_call_operand.vmem [shape: bf16[16,16,8], index: 2, kind: input, shape index: {}]   ;;  %s849_s3 = inlined_call_operand.vmem [shape: bf16[16,16,8], index: 3, kind: output, shape index: {}]  }
   0x1   :  { %s786_s14 = smov 0  }
   0x2 LB: > { %s32_s15 = sadd.s32 1, %s752_s13  ;;  %p650_p0 = scmp.ge.s32.totalorder %s756_s14, 1  ;;  %s756_s14 = sphi %s786_s14, %s13_s14   ;;  %s752_s13 = sphi %s784_s13, %s851_s13   ;;  %s748_s12 = sphi %s782_s12, %s850_s12  }
   0x3   : > { %p34_p1 = scmp.ge.s32.totalorder %s32_s15, 16  ;;  %p199_p2 = scmp.lt.s32.totalorder %s756_s14, 17 }
   0x5   : > { %s853_s15 = smov (%p34_p1, %s32_s15), 0  ;;  %p200_p3 = pnand %p650_p0, %p199_p2 }
   0x6   : > { %p250_p4 = scmp.lt.s32.totalorder (!%p200_p3), %s748_s12, 15 }
   0x7   : > { %203 = sbr.rel (%p200_p3) target bundleno = 796 (0x31c), region = 32 }
   0xc   : > { %vm300_vm0 = vcmask 64512   ;;  %v758_v0 = vmov 0.0   ;;  %vm759_vm1 = vmmov 0   ;;  %s855_s12 = smov (!%p250_p4, %s748_s12), 15  ;;  %vm295_vm2 = vcmask 7168  }
   0xd   : > { %678 = vmatprep.subr.bf16.mxu0 %v758_v0  ;;  %301 = vst.msk [vmem:[#allocation4] sm:$0xff] %vm300_vm0, %v758_v0  ;;  %302 = vst.msk [vmem:[#allocation4 + $0x8] sm:$0xff] %vm300_vm0, %v758_v0  ;;  %680 = vmatprep.mubr.msk.bf16.mxu0 %vm759_vm1, %v758_v0  ;;  %s802_s16 = sshll.u32 %s855_s12, 3  ;;  %v760_v8 = vmov -inf   ;;  %vm369_vm3 = vcmask 130048   ;;  %v761_v15 = vmov 0  }
   0xe   : > { %684 = vmatprep.subr.bf16.mxu1 %v758_v0  ;;  %686 = vmatprep.mubr.msk.bf16.mxu1 %vm759_vm1, %v758_v0  ;;  %s267_s19 = scalar_lea.vmem %s847_s1, %s802_s16  ;;  %s257_s22 = scalar_lea.vmem %s846_s0, %s802_s16  ;;  %296 = vst.msk [vmem:[#allocation2] sm:$0xff] %vm295_vm2, %v760_v8  ;;  %297 = vst.msk [vmem:[#allocation2 + $0x8] sm:$0xff] %vm295_vm2, %v760_v8  ;;  %vm517_vm4 = vcmask 60416  }
   0xf   : > { %v720_v1 = vld [vmem:[%s267_s19] sm:$0xff]   ;;  %298 = vst.msk [vmem:[#allocation3] sm:$0xff] %vm295_vm2, %v758_v0  ;;  %299 = vst.msk [vmem:[#allocation3 + $0x8] sm:$0xff] %vm295_vm2, %v758_v0  ;;  %718 = vset.pattern.permute.xlu1 %v761_v15  ;;  %719 = vset.pattern.permute.xlu0 %v761_v15  ;;  %s277_s25 = scalar_lea.vmem %s848_s2, %s802_s16  ;;  %s287_s28 = scalar_lea.vmem %s849_s3, %s802_s16 }
  0x10   : > { %v303_v2 = vld [vmem:[%s257_s22] sm:$0xf]  ;;  %v304_v3 = vld [vmem:[%s257_s22 + $0x4] sm:$0xf]  ;;  %v324_v4 = vsel %vm300_vm0, %v720_v1, 0 }
  0x11   : > { %v305_v5 = vmul.bf16 1052065461, %v303_v2  ;;  %v306_v6 = vmul.bf16 1052065461, %v304_v3  ;;  %679 = vmatpush3.bf16.xpose.msra.mxu0 %v324_v4  ;;  %v721_v24 = vld [vmem:[%s277_s25] sm:$0xff]  }
  0x12   : > { %685 = vmatpush3.bf16.msra.mxu1 %v721_v24 }
  0x13   : > { %v659_v7 = vcombine.low %v305_v5, %v306_v6 }
  0x14   : > { %v415_v52 = vld [vmem:[#allocation4] sm:$0xff]  ;;  %v416_v55 = vld [vmem:[#allocation4 + $0x8] sm:$0xff] }
  0x15   : > { %v367_v16 = vld [vmem:[#allocation2] sm:$0xff]  ;;  %v368_v19 = vld [vmem:[#allocation2 + $0x8] sm:$0xff] }
  0x16   : > { %v400_v40 = vld [vmem:[#allocation3] sm:$0xff]  ;;  %v401_v43 = vld [vmem:[#allocation3 + $0x8] sm:$0xff] }
  0x18   : > { %681 = vmatmul.mubr.msk.bf16.vlgmr.msra.gmra.mxu0 %vm300_vm0, %v659_v7 }
  0xd8   : > { %v360_v9 = vpop.f32.mrf.mxu0 }
  0xd9   : > { %v370_v10 = vsel %vm369_vm3, %v360_v9, -inf }
  0xda   : > { %371 = vmax.xlane.f32.xlu0 %v370_v10  ;;  %v682_v11 = vpop.f32.mrf.mxu0 }
  0xdc   : > { %v363_v12 = vpop.f32.mrf.mxu0 }
  0xdd   : > { %v373_v13 = vsel %vm369_vm3, %v363_v12, -inf }
  0xde   : > { %374 = vmax.xlane.f32.xlu0 %v373_v13  ;;  %v683_v14 = vpop.f32.mrf.mxu0 }
 0x163   : > { %v372_v17 = vpop.xlane.xlu0 %371 }
 0x164   : > { %v376_v18 = vmax.f32 %v367_v16, %v372_v17 }
 0x166   : > { %v378_v20 = vsub.f32 %v367_v16, %v376_v18  ;;  %486 = vst.msk [vmem:[#allocation2] sm:$0xff] %vm295_vm2, %v376_v18  ;;  %386 = vperm.xlu1 %718, %v376_v18  }
 0x167   : > { %v375_v21 = vpop.xlane.xlu0 %374 }
 0x168   : > { %v377_v22 = vmax.f32 %v368_v19, %v375_v21  ;;  %v380_v37 = vmul.f32 1.442695, %v378_v20 }
 0x16a   : > { %v379_v23 = vsub.f32 %v368_v19, %v377_v22  ;;  %487 = vst.msk [vmem:[#allocation2 + $0x8] sm:$0xff] %vm295_vm2, %v377_v22  ;;  %391 = vperm.xlu1 %718, %v377_v22  }
 0x16c   : > { %v382_v34 = vmul.f32 1.442695, %v379_v23 }
 0x1e1   : > { %v387_v25 = vpop.permute.xlu1 %386 }
 0x1e2   : > { %v394_v26 = vsub.f32 %v360_v9, %v387_v25 }
 0x1e4   : > { %v396_v27 = vmul.f32 1.442695, %v394_v26 }
 0x1e5   : > { %v392_v28 = vpop.permute.xlu1 %391 }
 0x1e6   : > { %722 = vpow2.f32 %v396_v27  ;;  %v395_v29 = vsub.f32 %v363_v12, %v392_v28 }
 0x1e8   : > { %v398_v30 = vmul.f32 1.442695, %v395_v29 }
 0x1ea   : > { %724 = vpow2.f32 %v398_v30 }
 0x1eb   : > { %726 = vpow2.f32 %v382_v34 }
 0x1ec   : > { %728 = vpow2.f32 %v380_v37 }
 0x1f3   : > { %v723_v31 = vpop.eup %722 }
 0x1f4   : > { %v404_v32 = vsel %vm369_vm3, %v723_v31, 0.0 }
 0x1f5   : > { %405 = vadd.xlane.f32.xlu0 %v404_v32 }
 0x1f7   : > { %v725_v33 = vpop.eup %724 }
 0x1f8   : > { %v407_v35 = vsel %vm369_vm3, %v725_v33, 0.0  ;;  %v429_v36 = vpack.c.bf16 %v725_v33, %v723_v31  ;;  %v727_v38 = vpop.eup %726 }
 0x1f9   : > { %408 = vadd.xlane.f32.xlu1 %v407_v35  ;;  %v729_v39 = vpop.eup %728  ;;  %v403_v45 = vmul.f32 %v727_v38, %v401_v43 }
 0x1fa   : > { %687 = vmatmul.mubr.msk.bf16.vlgmr.msra.gmra.mxu1 %vm369_vm3, %v429_v36  ;;  %v402_v41 = vmul.f32 %v729_v39, %v400_v40 }
 0x20a   : > { %424 = vperm.xlu1 %718, %v727_v38  }
 0x20b   : > { %419 = vperm.xlu0 %719, %v729_v39  }
 0x27e   : > { %v406_v42 = vpop.xlane.xlu0 %405 }
 0x27f   : > { %v410_v44 = vadd.f32 %v406_v42, %v402_v41 }
 0x281   : > { %413 = vst.msk [vmem:[#allocation3] sm:$0xff] %vm295_vm2, %v410_v44 }
 0x282   : > { %v409_v46 = vpop.xlane.xlu1 %408 }
 0x283   : > { %v411_v47 = vadd.f32 %v409_v46, %v403_v45 }
 0x285   : > { %414 = vst.msk [vmem:[#allocation3 + $0x8] sm:$0xff] %vm295_vm2, %v411_v47 }
 0x286   : > { %v420_v53 = vpop.permute.xlu0 %419  ;;  %v425_v56 = vpop.permute.xlu1 %424 }
 0x287   : > { %v427_v54 = vmul.f32 %v420_v53, %v415_v52  ;;  %v428_v60 = vmul.f32 %v425_v56, %v416_v55 }
 0x288   : > { %v493_v48 = vld [vmem:[#allocation3] sm:$0xff] }
 0x289   : > { %730 = vrcp.f32 %v493_v48 }
 0x28c   : > { %v494_v49 = vld [vmem:[#allocation3 + $0x8] sm:$0xff] }
 0x28d   : > { %732 = vrcp.f32 %v494_v49 }
 0x296   : > { %v731_v50 = vpop.eup %730 }
 0x297   : > { %499 = vperm.xlu0 %719, %v731_v50  }
 0x29a   : > { %v733_v51 = vpop.eup %732 }
 0x29b   : > { %504 = vperm.xlu0 %719, %v733_v51  }
 0x2ba   : > { %v475_v57 = vpop.f32.mrf.mxu1 }
 0x2bb   : > { %v482_v58 = vadd.f32 %v475_v57, %v427_v54 }
 0x2bc   : > { %v688_v59 = vpop.f32.mrf.mxu1 }
 0x2bd   : > { %484 = vst.msk [vmem:[#allocation4] sm:$0xff] %vm300_vm0, %v482_v58 }
 0x2be   : > { %v478_v61 = vpop.f32.mrf.mxu1 }
 0x2bf   : > { %v483_v62 = vadd.f32 %v478_v61, %v428_v60 }
 0x2c0   : > { %v689_v63 = vpop.f32.mrf.mxu1 }
 0x2c1   : > { %485 = vst.msk [vmem:[#allocation4 + $0x8] sm:$0xff] %vm300_vm0, %v483_v62 }
 0x2c4   : > { %v491_v0 = vld [vmem:[#allocation4] sm:$0xff] }
 0x2c8   : > { %v492_v4 = vld [vmem:[#allocation4 + $0x8] sm:$0xff] }
 0x312   : > { %v500_v1 = vpop.permute.xlu0 %499 }
 0x313   : > { %v507_v2 = vmul.f32 %v500_v1, %v491_v0 }
 0x315   : > { %v672_v3 = vpack.c.bf16 %v507_v2, %v507_v2 }
 0x316   : > { %v505_v5 = vpop.permute.xlu0 %504 }
 0x317   : > { %518 = vst.msk [vmem:[%s287_s28] sm:$0xf] %vm517_vm4, %v672_v3  ;;  %v508_v6 = vmul.f32 %v505_v5, %v492_v4 }
 0x319   : > { %v673_v7 = vpack.c.bf16 %v508_v6, %v508_v6 }
 0x31b   : > { %519 = vst.msk [vmem:[%s287_s28 + $0x4] sm:$0xf] %vm517_vm4, %v673_v7 }
 0x31c PF: > { %s13_s14 = sadd.s32 1, %s756_s14   ;;  %s850_s12 = smov %s752_s13 }
 0x31d   : > { %p10_p5 = scmp.ge.s32.totalorder %s13_s14, 18   ;;  %s851_s13 = smov %s853_s15 }
 0x31f   :  { %12 = sbr.rel (!%p10_p5) target bundleno = 2 (0x2), region = 76 }

// kernel: ast_forward.15
= control target key start
LH: loop header
LB: loop body
LE: loop exit
PB: predicated region body
PF: predicated region fallthrough
CT: control target
= control target key end

     0   :  { %vm34_vm0 = vcmask 257024   ;;  %s329_s0 = inlined_call_operand.vmem [shape: f32[4,32], index: 0, kind: input, shape index: {}]   ;;  %s330_s1 = inlined_call_operand.vmem [shape: f32[4,32], index: 1, kind: input, shape index: {}]   ;;  %s331_s2 = inlined_call_operand.vmem [shape: f32[1,32], index: 2, kind: input, shape index: {}]   ;;  %s332_s3 = inlined_call_operand.vmem [shape: f32[1,32], index: 3, kind: input, shape index: {}]   ;;  %s333_s4 = inlined_call_operand.vmem [shape: f32[1,32], index: 4, kind: input, shape index: {}]   ;;  %s334_s5 = inlined_call_operand.vmem [shape: f32[1,32], index: 5, kind: input, shape index: {}]   ;;  %s335_s6 = inlined_call_operand.vmem [shape: bf16[32,128], index: 6, kind: input, shape index: {}]   ;;  %s336_s7 = inlined_call_operand.vmem [shape: f32[1,128], index: 7, kind: input, shape index: {}]   ;;  %s337_s8 = inlined_call_operand.hbm [shape: f32[4,128], index: 8, kind: output, shape index: {}]  }
   0x1   :  { %v31_v0 = vld [vmem:[%s329_s0] sm:$0xf] }
   0x2   :  { %v63_v1 = vld [vmem:[%s330_s1] sm:$0xf]  ;;  %v35_v2 = vsel %vm34_vm0, %v31_v0, 0.0 }
   0x3   :  { %36 = vadd.xlane.f32.xlu0 %v35_v2 }
   0x4   :  { %13 = vsyncpa [#allocation3], 0  ;;  %v64_v3 = vsel %vm34_vm0, %v63_v1, 0.0  ;;  %v193_v22 = vld [vmem:[%s331_s2] ss:$0 sm:$0xff]  ;;  %v215_v38 = vld [vmem:[%s335_s6 + $0x8] sm:$0xff]  }
   0x5   :  { %v194_v26 = vld [vmem:[%s332_s3] ss:$0 sm:$0xff]  ;;  %v245_v39 = vmov 0.0   ;;  %vm246_vm1 = vmmov 0   ;;  %vm134_vm2 = vcmask 261120   ;;  %s247_s18 = smov [#allocation2]  }
   0x6   :  { %204 = vmatprep.subr.bf16.mxu0 %v245_v39  ;;  %208 = vmatprep.mubr.msk.bf16.mxu0 %vm246_vm1, %v245_v39  ;;  %v216_v40 = vld [vmem:[%s335_s6] sm:$0xff]   ;;  %s185_s19 = sshll.u32 %s247_s18, 4  ;;  %s186_s19 = int_to_ptr.vmem [resolvable:$true] %s185_s19 }
   0x7   :  { %65 = vadd.xlane.f32.xlu0 %v64_v3  ;;  %205 = vmatpush3.bf16.msra.mxu0 %v215_v38  ;;  %v195_v45 = vld [vmem:[%s333_s4] ss:$0 sm:$0xff]  ;;  %s223_s4 = scalar_lea.vmem %s186_s19, 64  ;;  %p228_p1 = scmp.lt.s32.totalorder %s186_s19, %s186_s19 }
   0x8   :  { %206 = vmatprep.subr.bf16.mxu0 %v245_v39  ;;  %v196_v47 = vld [vmem:[%s334_s5] ss:$0 sm:$0xff]  ;;  %p224_p0 = scmp.ne.s32.totalorder %s186_s19, %s223_s4  ;;  %p229_p2 = scmp.lt.s32.totalorder %s223_s4, %s223_s4 }
   0x9   :  { %v197_v51 = vld [vmem:[%s336_s7] ss:$0 sm:$0xff] }
   0xa   :  { %p230_p3 = por %p229_p2, %p228_p1 }
   0xb   :  { %207 = vmatpush3.bf16.msra.mxu0 %v216_v40 }
   0xc   :  { %p231_p4 = pnand %p230_p3, %p224_p0 }
  0x8c   :  { %v37_v4 = vpop.xlane.xlu0 %36 }
  0x8d   :  { %v39_v5 = vmul.f32 0.03125, %v37_v4 }
  0x8f   :  { %v40_v6 = vsub.f32 %v31_v0, %v39_v5 }
  0x90   :  { %v66_v7 = vpop.xlane.xlu0 %65 }
  0x91   :  { %v67_v8 = vmul.f32 0.03125, %v66_v7  ;;  %v41_v9 = vmul.f32 %v40_v6, %v40_v6 }
  0x93   :  { %v68_v10 = vsub.f32 %v63_v1, %v67_v8  ;;  %v42_v11 = vsel %vm34_vm0, %v41_v9, 0.0 }
  0x94   :  { %43 = vadd.xlane.f32.xlu1 %v42_v11 }
  0x95   :  { %v69_v12 = vmul.f32 %v68_v10, %v68_v10 }
  0x97   :  { %v70_v13 = vsel %vm34_vm0, %v69_v12, 0.0 }
  0x98   :  { %71 = vadd.xlane.f32.xlu1 %v70_v13 }
 0x11d   :  { %v44_v14 = vpop.xlane.xlu1 %43 }
 0x11e   :  { %v45_v15 = vmul.f32 0.03125, %v44_v14 }
 0x120   :  { %v46_v16 = vadd.f32 1e-12, %v45_v15 }
 0x121   :  { %v72_v17 = vpop.xlane.xlu1 %71 }
 0x122   :  { %217 = vrsqrt.f32 %v46_v16  ;;  %v73_v18 = vmul.f32 0.03125, %v72_v17 }
 0x124   :  { %v74_v19 = vadd.f32 1e-12, %v73_v18 }
 0x126   :  { %219 = vrsqrt.f32 %v74_v19 }
 0x12f   :  { %v218_v20 = vpop.eup %217 }
 0x130   :  { %v48_v21 = vmul.f32 %v218_v20, %v40_v6 }
 0x132   :  { %v55_v24 = vmul.f32 %v193_v22, %v48_v21 }
 0x133   :  { %v220_v23 = vpop.eup %219 }
 0x134   :  { %v76_v25 = vmul.f32 %v220_v23, %v68_v10  ;;  %v62_v28 = vadd.f32 %v194_v26, %v55_v24 }
 0x136   :  { %v77_v27 = vmul.f32 %v193_v22, %v76_v25 }
 0x138   :  { %v78_v29 = vadd.f32 %v194_v26, %v77_v27 }
 0x13a   :  { %v79_v30 = vadd.f32 %v78_v29, %v62_v28 }
 0x13c   :  { %v80_v31 = vmul.f32 0.5, %v79_v30 }
 0x13e   :  { %v83_v32 = vsel %vm34_vm0, %v80_v31, 0.0 }
 0x13f   :  { %84 = vadd.xlane.f32.xlu0 %v83_v32 }
 0x1c8   :  { %v85_v33 = vpop.xlane.xlu0 %84 }
 0x1c9   :  { %v86_v34 = vmul.f32 0.03125, %v85_v33 }
 0x1cb   :  { %v87_v35 = vsub.f32 %v80_v31, %v86_v34 }
 0x1cd   :  { %v88_v36 = vmul.f32 %v87_v35, %v87_v35 }
 0x1cf   :  { %v89_v37 = vsel %vm34_vm0, %v88_v36, 0.0 }
 0x1d0   :  { %90 = vadd.xlane.f32.xlu1 %v89_v37 }
 0x259   :  { %v91_v41 = vpop.xlane.xlu1 %90 }
 0x25a   :  { %v92_v42 = vmul.f32 0.03125, %v91_v41 }
 0x25c   :  { %v93_v43 = vadd.f32 1e-12, %v92_v42 }
 0x25e   :  { %221 = vrsqrt.f32 %v93_v43 }
 0x26b   :  { %v222_v44 = vpop.eup %221 }
 0x26c   :  { %v95_v46 = vmul.f32 %v222_v44, %v87_v35 }
 0x26e   :  { %v102_v48 = vmul.f32 %v195_v45, %v95_v46 }
 0x270   :  { %v109_v49 = vadd.f32 %v196_v47, %v102_v48 }
 0x272   :  { %v110_v50 = vpack.c.bf16 %v109_v49, %v109_v49 }
 0x274   :  { %209 = vmatmul.mubr.msk.bf16.vlgmr.msra.gmra.mxu0 %vm134_vm2, %v110_v50 }
 0x334   :  { %v172_v52 = vpop.f32.mrf.mxu0 }
 0x335   :  { %v173_v53 = vadd.f32 %v197_v51, %v172_v52 }
 0x336   :  { %v210_v54 = vpop.f32.mrf.mxu0 }
 0x337   :  { %178 = vst [vmem:[#allocation2] sm:$0xf] %v173_v53 }
 0x338   :  { %v175_v55 = vpop.f32.mrf.mxu0 }
 0x339   :  { %234 = shalt.err (!%p231_p4)
}
 0x33a   :  { %188 = dma.vmem_to_hbm [thread:$0]  %s186_s19, 64, %s337_s8, [#allocation3]   ;;  %v211_v56 = vpop.f32.mrf.mxu0 }
 0x33b   :  { %243 = dma.done.wait [#allocation3], 64  }
 0x33c   :  { %244 = vsyncadd [#allocation3], 4294967232 }
 0x33d   :  { %192 = vsyncpa [#allocation3], 1 }

// kernel: ast_forward.11
= control target key start
LH: loop header
LB: loop body
LE: loop exit
PB: predicated region body
PF: predicated region fallthrough
CT: control target
= control target key end

     0   :  { %s914_s13 = smov 0   ;;  %s1010_s0 = inlined_call_operand.vmem [shape: f32[64,32], index: 0, kind: input, shape index: {}]   ;;  %s1011_s1 = inlined_call_operand.vmem [shape: bf16[64,32], index: 1, kind: input, shape index: {}]   ;;  %s1012_s2 = inlined_call_operand.vmem [shape: bf16[32,32], index: 2, kind: input, shape index: {}]   ;;  %s1013_s3 = inlined_call_operand.vmem [shape: f32[1,32], index: 3, kind: input, shape index: {}]   ;;  %s1014_s4 = inlined_call_operand.vmem [shape: f32[1,32], index: 4, kind: input, shape index: {}]   ;;  %s1015_s5 = inlined_call_operand.vmem [shape: f32[1,32], index: 5, kind: input, shape index: {}]   ;;  %s1016_s6 = inlined_call_operand.vmem [shape: bf16[32,64], index: 6, kind: input, shape index: {}]   ;;  %s1017_s7 = inlined_call_operand.vmem [shape: f32[1,64], index: 7, kind: input, shape index: {}]   ;;  %s1018_s8 = inlined_call_operand.vmem [shape: bf16[64,32], index: 8, kind: input, shape index: {}]   ;;  %s1019_s9 = inlined_call_operand.vmem [shape: f32[1,32], index: 9, kind: input, shape index: {}]   ;;  %s1020_s10 = inlined_call_operand.vmem [shape: f32[64,32], index: 10, kind: output, shape index: {}]  }
   0x1 LB: > { %s753_s14 = sadd.s32 4294967295, %s855_s13   ;;  %p757_p0 = scmp.ge.s32.totalorder %s855_s13, 1  ;;  %s855_s13 = sphi %s914_s13, %s20_s13  }
   0x2   : > { %p324_p1 = scmp.lt.s32.totalorder %s855_s13, 5 }
   0x4   : > { %p325_p2 = pnand %p757_p0, %p324_p1 }
   0x5   : > { %s758_s19 = sshll.u32 (!%p325_p2), %s753_s14, 1 }
   0x6   : > { %328 = sbr.rel (%p325_p2) target bundleno = 962 (0x3c2), region = 60  ;;  %p368_p3 = scmp.lt.s32.totalorder (!%p325_p2), %s758_s19, 7 }
   0xb   : > { %v832_v0 = vld [vmem:[%s1012_s2 + $0x8] sm:$0xff]   ;;  %v857_v1 = vmov 0.0   ;;  %v833_v2 = vld [vmem:[%s1012_s2] sm:$0xff]   ;;  %vm858_vm0 = vmmov 0   ;;  %s1022_s19 = smov (!%p368_p3, %s758_s19), 7  ;;  %vm418_vm1 = vcmask 261120  }
   0xc   : > { %794 = vmatprep.subr.bf16.mxu1 %v857_v1  ;;  %810 = vmatprep.subr.bf16.mxu0 %v857_v1  ;;  %s761_s20 = sshll.u32 %s1022_s19, 2  ;;  %s759_s24 = sshll.u32 %s1022_s19, 3  ;;  %v764_v4 = vld [vmem:[%s1013_s3] ss:$0 sm:$0xff]  ;;  %v835_v27 = vld [vmem:[%s1016_s6 + $0x8] sm:$0xff]   ;;  %v837_v46 = vld [vmem:[%s1018_s8 + $0x18] sm:$0xff]  }
   0xd   : > { %795 = vmatpush3.bf16.msra.mxu1 %v832_v0  ;;  %798 = vmatprep.mubr.msk.bf16.mxu1 %vm858_vm0, %v857_v1  ;;  %s377_s23 = scalar_lea.vmem %s1011_s1, %s761_s20  ;;  %s371_s27 = scalar_lea.vmem %s1010_s0, %s759_s24  ;;  %v836_v28 = vld [vmem:[%s1016_s6] sm:$0xff]   ;;  %v838_v47 = vld [vmem:[%s1018_s8 + $0x10] sm:$0xff]   ;;  %v839_v48 = vld [vmem:[%s1018_s8 + $0x8] sm:$0xff]   ;;  %vm636_vm2 = vcmask 523264  }
   0xe   : > { %796 = vmatprep.subr.bf16.mxu1 %v857_v1  ;;  %818 = vmatprep.mubr.msk.bf16.mxu0 %vm858_vm0, %v857_v1  ;;  %v834_v3 = vld [vmem:[%s377_s23] sm:$0xff]   ;;  %v387_v10 = vld [vmem:[%s371_s27 + $0x8] sm:$0xff]  ;;  %s383_s16 = scalar_lea.vmem %s1020_s10, %s759_s24 }
   0xf   : > { %v386_v5 = vld [vmem:[%s371_s27] sm:$0xff]  ;;  %811 = vmatpush3.bf16.msra.mxu0 %v837_v46 }
  0x10   : > { %v769_v37 = vld [vmem:[%s1014_s4] ss:$0 sm:$0xff]  ;;  %812 = vmatprep.subr.bf16.mxu0 %v857_v1 }
  0x11   : > { %797 = vmatpush3.bf16.msra.mxu1 %v833_v2  ;;  %v770_v41 = vld [vmem:[%s1015_s5] ss:$0 sm:$0xff] }
  0x12   : > { %802 = vmatprep.subr.bf16.mxu1 %v857_v1  ;;  %v840_v49 = vld [vmem:[%s1018_s8] sm:$0xff]  }
  0x13   : > { %813 = vmatpush3.bf16.msra.mxu0 %v838_v47  ;;  %v771_v50 = vld [vmem:[%s1017_s7] ss:$0 sm:$0xff] }
  0x14   : > { %799 = vmatmul.mubr.msk.bf16.vlgmr.msra.gmra.mxu1 %vm418_vm1, %v834_v3  ;;  %814 = vmatprep.subr.bf16.mxu0 %v857_v1 }
  0x15   : > { %806 = vmatprep.mubr.msk.bf16.mxu1 %vm858_vm0, %v857_v1  ;;  %803 = vmatpush3.bf16.msra.mxu1 %v835_v27 }
  0x16   : > { %804 = vmatprep.subr.bf16.mxu1 %v857_v1 }
  0x17   : > { %815 = vmatpush3.bf16.msra.mxu0 %v839_v48 }
  0x18   : > { %816 = vmatprep.subr.bf16.mxu0 %v857_v1 }
  0x19   : > { %805 = vmatpush3.bf16.msra.mxu1 %v836_v28 }
  0x1b   : > { %817 = vmatpush3.bf16.msra.mxu0 %v840_v49 }
  0xd4   : > { %v456_v6 = vpop.f32.mrf.mxu1 }
  0xd5   : > { %v457_v7 = vadd.f32 %v764_v4, %v456_v6 }
  0xd6   : > { %v800_v8 = vpop.f32.mrf.mxu1 }
  0xd7   : > { %v951_v9 = vadd.f32 %v457_v7, %v386_v5 }
  0xd8   : > { %v459_v11 = vpop.f32.mrf.mxu1 }
  0xd9   : > { %v460_v12 = vadd.f32 %v764_v4, %v459_v11  ;;  %v467_v13 = vsel %vm418_vm1, %v951_v9, 0.0 }
  0xda   : > { %v801_v14 = vpop.f32.mrf.mxu1  ;;  %468 = vadd.xlane.f32.xlu0 %v467_v13  ;;  %v775_v13 = vld [vmem:[%s1019_s9] ss:$0 sm:$0xff] }
  0xdb   : > { %v955_v15 = vadd.f32 %v460_v12, %v387_v10 }
  0xdd   : > { %v470_v16 = vsel %vm418_vm1, %v955_v15, 0.0 }
  0xde   : > { %471 = vadd.xlane.f32.xlu0 %v470_v16 }
 0x163   : > { %v469_v17 = vpop.xlane.xlu0 %468 }
 0x164   : > { %v474_v18 = vmul.f32 0.03125, %v469_v17 }
 0x166   : > { %v476_v19 = vsub.f32 %v951_v9, %v474_v18 }
 0x167   : > { %v472_v20 = vpop.xlane.xlu0 %471 }
 0x168   : > { %v475_v21 = vmul.f32 0.03125, %v472_v20  ;;  %v478_v22 = vmul.f32 %v476_v19, %v476_v19 }
 0x16a   : > { %v477_v23 = vsub.f32 %v955_v15, %v475_v21  ;;  %v480_v24 = vsel %vm418_vm1, %v478_v22, 0.0 }
 0x16b   : > { %481 = vadd.xlane.f32.xlu1 %v480_v24 }
 0x16c   : > { %v479_v25 = vmul.f32 %v477_v23, %v477_v23 }
 0x16e   : > { %v483_v26 = vsel %vm418_vm1, %v479_v25, 0.0 }
 0x16f   : > { %484 = vadd.xlane.f32.xlu1 %v483_v26 }
 0x1f4   : > { %v482_v29 = vpop.xlane.xlu1 %481 }
 0x1f5   : > { %v486_v30 = vmul.f32 0.03125, %v482_v29 }
 0x1f7   : > { %v488_v31 = vadd.f32 1e-12, %v486_v30 }
 0x1f8   : > { %v485_v32 = vpop.xlane.xlu1 %484 }
 0x1f9   : > { %841 = vrsqrt.f32 %v488_v31  ;;  %v487_v33 = vmul.f32 0.03125, %v485_v32 }
 0x1fb   : > { %v489_v34 = vadd.f32 1e-12, %v487_v33 }
 0x1fd   : > { %843 = vrsqrt.f32 %v489_v34 }
 0x206   : > { %v842_v35 = vpop.eup %841 }
 0x207   : > { %v492_v36 = vmul.f32 %v842_v35, %v476_v19 }
 0x209   : > { %v500_v40 = vmul.f32 %v769_v37, %v492_v36 }
 0x20a   : > { %v844_v38 = vpop.eup %843 }
 0x20b   : > { %v493_v39 = vmul.f32 %v844_v38, %v477_v23  ;;  %v508_v43 = vadd.f32 %v770_v41, %v500_v40 }
 0x20d   : > { %v501_v42 = vmul.f32 %v769_v37, %v493_v39 }
 0x20f   : > { %v509_v44 = vadd.f32 %v770_v41, %v501_v42 }
 0x211   : > { %v510_v45 = vpack.c.bf16 %v509_v44, %v508_v43 }
 0x213   : > { %807 = vmatmul.mubr.msk.bf16.vlgmr.msra.gmra.mxu1 %vm418_vm1, %v510_v45 }
 0x2d3   : > { %v571_v51 = vpop.f32.mrf.mxu1 }
 0x2d4   : > { %v572_v52 = vadd.f32 %v771_v50, %v571_v51 }
 0x2d5   : > { %v808_v53 = vpop.f32.mrf.mxu1 }
 0x2d6   : > { %v580_v54 = vmul.f32 0.044715, %v572_v52  ;;  %v578_v6 = vmul.f32 0.5, %v572_v52 }
 0x2d7   : > { %v574_v55 = vpop.f32.mrf.mxu1 }
 0x2d8   : > { %v582_v56 = vmul.f32 %v580_v54, %v572_v52  ;;  %v575_v57 = vadd.f32 %v771_v50, %v574_v55 }
 0x2d9   : > { %v809_v58 = vpop.f32.mrf.mxu1 }
 0x2da   : > { %v584_v59 = vmul.f32 %v582_v56, %v572_v52  ;;  %v581_v60 = vmul.f32 0.044715, %v575_v57  ;;  %v579_v7 = vmul.f32 0.5, %v575_v57 }
 0x2dc   : > { %v586_v61 = vadd.f32 %v584_v59, %v572_v52  ;;  %v583_v62 = vmul.f32 %v581_v60, %v575_v57 }
 0x2de   : > { %v588_v63 = vmul.f32 0.7978846, %v586_v61  ;;  %v585_v0 = vmul.f32 %v583_v62, %v575_v57 }
 0x2e0   : > { %845 = vtanh.f32 %v588_v63  ;;  %v587_v1 = vadd.f32 %v585_v0, %v575_v57 }
 0x2e2   : > { %v589_v2 = vmul.f32 0.7978846, %v587_v1 }
 0x2e4   : > { %847 = vtanh.f32 %v589_v2 }
 0x2ed   : > { %v846_v3 = vpop.eup %845 }
 0x2ee   : > { %v592_v4 = vadd.f32 1.0, %v846_v3 }
 0x2f0   : > { %v594_v10 = vmul.f32 %v592_v4, %v578_v6 }
 0x2f1   : > { %v848_v5 = vpop.eup %847 }
 0x2f2   : > { %v593_v8 = vadd.f32 1.0, %v848_v5 }
 0x2f4   : > { %v595_v11 = vmul.f32 %v593_v8, %v579_v7 }
 0x2f6   : > { %v596_v12 = vpack.c.bf16 %v595_v11, %v594_v10 }
 0x2f8   : > { %819 = vmatmul.mubr.msk.bf16.vlgmr.msra.gmra.mxu0 %vm636_vm2, %v596_v12 }
 0x3b8   : > { %v674_v14 = vpop.f32.mrf.mxu0 }
 0x3b9   : > { %v675_v16 = vadd.f32 %v775_v13, %v674_v14 }
 0x3ba   : > { %v820_v17 = vpop.f32.mrf.mxu0 }
 0x3bb   : > { %v681_v18 = vadd.f32 %v675_v16, %v951_v9 }
 0x3bc   : > { %v677_v19 = vpop.f32.mrf.mxu0 }
 0x3bd   : > { %683 = vst.msk [vmem:[%s383_s16] sm:$0xff] %vm418_vm1, %v681_v18  ;;  %v678_v20 = vadd.f32 %v775_v13, %v677_v19 }
 0x3be   : > { %v821_v21 = vpop.f32.mrf.mxu0 }
 0x3bf   : > { %v682_v22 = vadd.f32 %v678_v20, %v955_v15 }
 0x3c1   : > { %684 = vst.msk [vmem:[%s383_s16 + $0x8] sm:$0xff] %vm418_vm1, %v682_v22 }
 0x3c2 PF: > { %s20_s13 = sadd.s32 1, %s855_s13  }
 0x3c3   : > { %p17_p4 = scmp.ge.s32.totalorder %s20_s13, 6  }
 0x3c5   :  { %19 = sbr.rel (!%p17_p4) target bundleno = 1 (0x1), region = 93 }

</bundles_post_ra>
